<compile_context>
chip_gen: v5e
topology: v5e:2x2
jax: 0.10.0
libtpu: 0.0.40
codegen_flags: <defaults>
</compile_context>

<pallas_src>
import functools
import math

import jax
import jax.numpy as jnp
from jax.experimental import pallas as pl
from jax.experimental.pallas import tpu as pltpu


# ----------------------------- config ---------------------------------------
class Config:
    n_words = 100      # vocab size (Encoder input_dim)
    d_model = 32
    n_layers = 2
    n_heads = 4
    d_ff = 64
    d_biaffine = 32
    d_label = 16
    n_rels = 8
    pad_index = 0
    unk_index = 1
    mlp_dropout = 0.0  # identity at inference
    max_len = 64


# ----------------------------- fused kernel ----------------------------------
def _parser_kernel(x_ref, m_ref,
                   wqkv_ref, bqkv_ref, wo_ref, bo_ref,
                   ln1g_ref, ln1b_ref, wf1_ref, bf1_ref, wf2_ref, bf2_ref,
                   ln2g_ref, ln2b_ref,
                   wh_ref, bh_ref, warc_w_ref, warc_b_ref, wrel_w_ref, wrel_b_ref,
                   sarc_ref, srel_ref,
                   *, n_layers, n_heads, d_model, d_biaffine, d_label, n_rels,
                   ln_eps, neg_slope):
    f32 = jnp.float32
    dh = d_model // n_heads
    scale = f32(1.0 / math.sqrt(dh))

    x = x_ref[0]                       # (S, D)
    key_mask = m_ref[0]                # (1, S): 1.0 for real tokens, 0.0 for pad

    def layer_norm(v, g, b):
        mu = jnp.mean(v, axis=-1, keepdims=True)
        var = jnp.mean((v - mu) ** 2, axis=-1, keepdims=True)
        return (v - mu) * jax.lax.rsqrt(var + ln_eps) * g + b

    for l in range(n_layers):          # static unroll (n_layers is tiny)
        # ---- fused QKV projection: one (S, D) @ (D, 3D) matmul ----
        qkv = jnp.dot(x, wqkv_ref[l], preferred_element_type=f32) + bqkv_ref[l]

        def split_heads(base):
            return jnp.stack(
                [qkv[:, base + h * dh: base + (h + 1) * dh] for h in range(n_heads)],
                axis=0)                                            # (H, S, Dh)

        q = split_heads(0)
        k = split_heads(d_model)
        v = split_heads(2 * d_model)

        # ---- batched attention over all heads (single MXU contraction) ----
        e = jnp.einsum("hqd,hkd->hqk", q, k,
                       preferred_element_type=f32) * scale          # (H, S, S)
        e = jnp.where(key_mask[None, :, :] > 0, e, f32(-1e10))
        e = e - jnp.max(e, axis=-1, keepdims=True)
        p = jnp.exp(e)
        p = p / jnp.sum(p, axis=-1, keepdims=True)
        a = jnp.einsum("hqk,hkd->hqd", p, v,
                       preferred_element_type=f32)                  # (H, S, Dh)
        a = jnp.concatenate([a[h] for h in range(n_heads)], axis=-1)  # (S, D)

        a = jnp.dot(a, wo_ref[l], preferred_element_type=f32) + bo_ref[l]
        x = layer_norm(x + a, ln1g_ref[l], ln1b_ref[l])              # post-norm

        ff = jnp.dot(x, wf1_ref[l], preferred_element_type=f32) + bf1_ref[l]
        ff = jnp.maximum(ff, 0.0)                                    # ReLU
        ff = jnp.dot(ff, wf2_ref[l], preferred_element_type=f32) + bf2_ref[l]
        x = layer_norm(x + ff, ln2g_ref[l], ln2b_ref[l])

    # ---- fused MLP heads: one (S, D) @ (D, 2*db+2*dl) matmul + LeakyReLU ----
    hcat = jnp.dot(x, wh_ref[...], preferred_element_type=f32) + bh_ref[...]
    hcat = jnp.where(hcat > 0, hcat, neg_slope * hcat)               # slope 0.1
    db, dl = d_biaffine, d_label
    arc_h = hcat[:, 0:db]
    arc_d = hcat[:, db:2 * db]
    rel_h = hcat[:, 2 * db:2 * db + dl]
    rel_d = hcat[:, 2 * db + dl:2 * db + 2 * dl]

    # ---- arc biaffine (bias_x folded into warc_b row; bias_y=False) ----
    t_arc = jnp.dot(arc_d, warc_w_ref[...], preferred_element_type=f32) + warc_b_ref[...]
    s_arc = jax.lax.dot_general(t_arc, arc_h, (((1,), (1,)), ((), ())),
                                preferred_element_type=f32)          # (S_dep, S_head)
    # fold the final -inf head-position mask into the kernel epilogue
    sarc_ref[0] = jnp.where(key_mask > 0, s_arc, -jnp.inf)

    # ---- rel biaffine: first contraction as ONE wide lane-dense matmul ----
    #   t_rel[x, o*(dl+1)+j] = sum_i rel_d[x,i] W[o,i,j] + W[o,dl,j]   (bias_x)
    t_rel = jnp.dot(rel_d, wrel_w_ref[...], preferred_element_type=f32) + wrel_b_ref[...]
    j = dl + 1
    for o in range(n_rels):            # static unroll; second contraction per label
        t_o = t_rel[:, o * j:(o + 1) * j]                            # (S, dl+1)
        s_o = jax.lax.dot_general(t_o[:, :dl], rel_h, (((1,), (1,)), ((), ())),
                                  preferred_element_type=f32)        # (S, S)
        srel_ref[0, o] = s_o + t_o[:, dl:dl + 1]                     # bias_y term


# ----------------------------- parameters ------------------------------------
def init_params(key, cfg):
    keys = iter(jax.random.split(key, 64))

    def w(*shape):
        return (0.02 * jax.random.normal(next(keys), shape)).astype(jnp.float32)

    def zeros(*shape):
        return jnp.zeros(shape, jnp.float32)

    def ones(*shape):
        return jnp.ones(shape, jnp.float32)

    d, f = cfg.d_model, cfg.d_ff
    layers = []
    for _ in range(cfg.n_layers):
        layers.append(dict(
            Wq=w(d, d), bq=zeros(d), Wk=w(d, d), bk=zeros(d),
            Wv=w(d, d), bv=zeros(d), Wo=w(d, d), bo=zeros(d),
            ln1_g=ones(d), ln1_b=zeros(d),
            Wf1=w(d, f), bf1=zeros(f), Wf2=w(f, d), bf2=zeros(d),
            ln2_g=ones(d), ln2_b=zeros(d),
        ))
    return dict(
        tok_emb=w(cfg.n_words, d),
        pos_emb=w(cfg.max_len, d),
        layers=layers,
        W_arc_h=w(d, cfg.d_biaffine), b_arc_h=zeros(cfg.d_biaffine),
        W_arc_d=w(d, cfg.d_biaffine), b_arc_d=zeros(cfg.d_biaffine),
        W_rel_h=w(d, cfg.d_label), b_rel_h=zeros(cfg.d_label),
        W_rel_d=w(d, cfg.d_label), b_rel_d=zeros(cfg.d_label),
        # Biaffine(n_in=d_biaffine, n_out=1, bias_x=True, bias_y=False)
        W_attn_arc=w(1, cfg.d_biaffine + 1, cfg.d_biaffine),
        # Biaffine(n_in=d_label, n_out=n_rels, bias_x=True, bias_y=True)
        W_attn_rel=w(cfg.n_rels, cfg.d_label + 1, cfg.d_label + 1),
    )


def pack_params(params, cfg):
    """Fuse / stack the PyTorch-style params into the kernel's layout (done once)."""
    lp = params["layers"]

    def stk(f):
        return jnp.stack([f(l) for l in lp], axis=0)

    wqkv = stk(lambda l: jnp.concatenate([l["Wq"], l["Wk"], l["Wv"]], axis=1))
    bqkv = stk(lambda l: jnp.concatenate([l["bq"], l["bk"], l["bv"]], axis=0))[:, None, :]
    wo = stk(lambda l: l["Wo"]);   bo = stk(lambda l: l["bo"])[:, None, :]
    ln1g = stk(lambda l: l["ln1_g"])[:, None, :]
    ln1b = stk(lambda l: l["ln1_b"])[:, None, :]
    wf1 = stk(lambda l: l["Wf1"]); bf1 = stk(lambda l: l["bf1"])[:, None, :]
    wf2 = stk(lambda l: l["Wf2"]); bf2 = stk(lambda l: l["bf2"])[:, None, :]
    ln2g = stk(lambda l: l["ln2_g"])[:, None, :]
    ln2b = stk(lambda l: l["ln2_b"])[:, None, :]

    wh = jnp.concatenate([params["W_arc_h"], params["W_arc_d"],
                          params["W_rel_h"], params["W_rel_d"]], axis=1)
    bh = jnp.concatenate([params["b_arc_h"], params["b_arc_d"],
                          params["b_rel_h"], params["b_rel_d"]], axis=0)[None, :]

    db, dl, nr = cfg.d_biaffine, cfg.d_label, cfg.n_rels
    warc = params["W_attn_arc"][0]                       # (db+1, db)
    warc_w, warc_b = warc[:db, :], warc[db:db + 1, :]
    # W[o,i,j] -> W2[i, o*(dl+1)+j]; split off the bias_x row (i == dl).
    wrel2 = jnp.transpose(params["W_attn_rel"], (1, 0, 2)).reshape(dl + 1, nr * (dl + 1))
    wrel_w, wrel_b = wrel2[:dl, :], wrel2[dl:dl + 1, :]

    return dict(tok_emb=params["tok_emb"], pos_emb=params["pos_emb"],
                wqkv=wqkv, bqkv=bqkv, wo=wo, bo=bo, ln1g=ln1g, ln1b=ln1b,
                wf1=wf1, bf1=bf1, wf2=wf2, bf2=bf2, ln2g=ln2g, ln2b=ln2b,
                wh=wh, bh=bh, warc_w=warc_w, warc_b=warc_b,
                wrel_w=wrel_w, wrel_b=wrel_b)


# ----------------------------- forward ---------------------------------------
def forward(pp, words, chars, cfg):
    # `chars` is accepted but unused, matching the PyTorch forward signature.
    del chars
    bsz, s = words.shape
    d, hds, nl = cfg.d_model, cfg.n_heads, cfg.n_layers
    db, dl, nr, dff = cfg.d_biaffine, cfg.d_label, cfg.n_rels, cfg.d_ff

    mask_f = (words != cfg.pad_index).astype(jnp.float32)[:, None, :]   # (B, 1, S)
    # Embedding gather stays in plain JAX (data-dependent gather).
    x = pp["tok_emb"][words] * jnp.float32(math.sqrt(d)) + pp["pos_emb"][:s][None]

    kernel = functools.partial(
        _parser_kernel, n_layers=nl, n_heads=hds, d_model=d,
        d_biaffine=db, d_label=dl, n_rels=nr, ln_eps=1e-5, neg_slope=0.1)

    wide = 2 * db + 2 * dl
    oj = nr * (dl + 1)

    def full(shape):
        return pl.BlockSpec(shape, lambda b, _n=len(shape): (0,) * _n)

    s_arc, s_rel_osy = pl.pallas_call(
        kernel,
        out_shape=(jax.ShapeDtypeStruct((bsz, s, s), jnp.float32),
                   jax.ShapeDtypeStruct((bsz, nr, s, s), jnp.float32)),
        grid=(bsz,),
        in_specs=[
            pl.BlockSpec((1, s, d), lambda b: (b, 0, 0)),
            pl.BlockSpec((1, 1, s), lambda b: (b, 0, 0)),
            full((nl, d, 3 * d)), full((nl, 1, 3 * d)),
            full((nl, d, d)), full((nl, 1, d)),
            full((nl, 1, d)), full((nl, 1, d)),
            full((nl, d, dff)), full((nl, 1, dff)),
            full((nl, dff, d)), full((nl, 1, d)),
            full((nl, 1, d)), full((nl, 1, d)),
            full((d, wide)), full((1, wide)),
            full((db, db)), full((1, db)),
            full((dl, oj)), full((1, oj)),
        ],
        out_specs=(pl.BlockSpec((1, s, s), lambda b: (b, 0, 0)),
                   pl.BlockSpec((1, nr, s, s), lambda b: (b, 0, 0, 0))),
        compiler_params=pltpu.CompilerParams(dimension_semantics=("parallel",)),
    )(x, mask_f,
      pp["wqkv"], pp["bqkv"], pp["wo"], pp["bo"], pp["ln1g"], pp["ln1b"],
      pp["wf1"], pp["bf1"], pp["wf2"], pp["bf2"], pp["ln2g"], pp["ln2b"],
      pp["wh"], pp["bh"], pp["warc_w"], pp["warc_b"], pp["wrel_w"], pp["wrel_b"])

    # TODO(synk): the (B, n_rels, S, S) -> (B, S, S, n_rels) permute stays in XLA;
    # writing n_rels as the lane-minor output axis from the kernel would need a
    # minor-dim relayout that is not worth it at n_rels=8.
    s_rel = jnp.transpose(s_rel_osy, (0, 2, 3, 1))
    return s_arc, s_rel


# ----------------------------- main ------------------------------------------
if __name__ == "__main__":
    cfg = Config()
    key = jax.random.PRNGKey(0)
    pkey, wkey = jax.random.split(key)
    params = init_params(pkey, cfg)
    packed = pack_params(params, cfg)

    B, S = 2, 8
    words = jax.random.randint(wkey, (B, S), 2, cfg.n_words, dtype=jnp.int32)
    words = words.at[1, 6:].set(cfg.pad_index)          # pad tail of sentence 1
    chars = jnp.zeros((B, S, 4), jnp.int32)             # unused by forward

    fwd = jax.jit(lambda pp, w, c: forward(pp, w, c, cfg))
    s_arc, s_rel = fwd(packed, words, chars)
    jax.block_until_ready((s_arc, s_rel))

    assert s_arc.shape == (B, S, S)
    assert s_rel.shape == (B, S, S, cfg.n_rels)
    assert s_arc.dtype == jnp.float32 and s_rel.dtype == jnp.float32
    # padded head positions must be -inf for every dependent
    assert bool(jnp.all(jnp.isneginf(s_arc[1, :, 6:])))
    assert bool(jnp.all(jnp.isfinite(s_rel)))
    print("KERNEL_OK")
</pallas_src>

<mosaic_0001>
module attributes {stable_mosaic.version = 11 : i64} {
  func.func @_parser_kernel(%arg0: i32, %arg1: memref<1x8x32xf32, #tpu.memory_space<vmem>>, %arg2: memref<1x1x8xf32, #tpu.memory_space<vmem>>, %arg3: memref<2x32x96xf32, #tpu.memory_space<vmem>>, %arg4: memref<2x1x96xf32, #tpu.memory_space<vmem>>, %arg5: memref<2x32x32xf32, #tpu.memory_space<vmem>>, %arg6: memref<2x1x32xf32, #tpu.memory_space<vmem>>, %arg7: memref<2x1x32xf32, #tpu.memory_space<vmem>>, %arg8: memref<2x1x32xf32, #tpu.memory_space<vmem>>, %arg9: memref<2x32x64xf32, #tpu.memory_space<vmem>>, %arg10: memref<2x1x64xf32, #tpu.memory_space<vmem>>, %arg11: memref<2x64x32xf32, #tpu.memory_space<vmem>>, %arg12: memref<2x1x32xf32, #tpu.memory_space<vmem>>, %arg13: memref<2x1x32xf32, #tpu.memory_space<vmem>>, %arg14: memref<2x1x32xf32, #tpu.memory_space<vmem>>, %arg15: memref<32x96xf32, #tpu.memory_space<vmem>>, %arg16: memref<1x96xf32, #tpu.memory_space<vmem>>, %arg17: memref<32x32xf32, #tpu.memory_space<vmem>>, %arg18: memref<1x32xf32, #tpu.memory_space<vmem>>, %arg19: memref<16x136xf32, #tpu.memory_space<vmem>>, %arg20: memref<1x136xf32, #tpu.memory_space<vmem>>, %arg21: memref<1x8x8xf32, #tpu.memory_space<vmem>>, %arg22: memref<1x8x8x8xf32, #tpu.memory_space<vmem>>) attributes {dimension_semantics = [#tpu.dimension_semantics<parallel>], iteration_bounds = array<i64: 2>, scalar_prefetch = 0 : i64, scratch_operands = 0 : i64, tpu.core_type = #tpu.core_type<tc>, window_params = [{transform_indices = @transform_0, window_bounds = array<i64: 1, 8, 32>}, {transform_indices = @transform_1, window_bounds = array<i64: 1, 1, 8>}, {pipeline_mode = #tpu.pipeline_mode<synchronous>, transform_indices = @transform_2, window_bounds = array<i64: 2, 32, 96>}, {pipeline_mode = #tpu.pipeline_mode<synchronous>, transform_indices = @transform_3, window_bounds = array<i64: 2, 1, 96>}, {pipeline_mode = #tpu.pipeline_mode<synchronous>, transform_indices = @transform_4, window_bounds = array<i64: 2, 32, 32>}, {pipeline_mode = #tpu.pipeline_mode<synchronous>, transform_indices = @transform_5, window_bounds = array<i64: 2, 1, 32>}, {pipeline_mode = #tpu.pipeline_mode<synchronous>, transform_indices = @transform_6, window_bounds = array<i64: 2, 1, 32>}, {pipeline_mode = #tpu.pipeline_mode<synchronous>, transform_indices = @transform_7, window_bounds = array<i64: 2, 1, 32>}, {pipeline_mode = #tpu.pipeline_mode<synchronous>, transform_indices = @transform_8, window_bounds = array<i64: 2, 32, 64>}, {pipeline_mode = #tpu.pipeline_mode<synchronous>, transform_indices = @transform_9, window_bounds = array<i64: 2, 1, 64>}, {pipeline_mode = #tpu.pipeline_mode<synchronous>, transform_indices = @transform_10, window_bounds = array<i64: 2, 64, 32>}, {pipeline_mode = #tpu.pipeline_mode<synchronous>, transform_indices = @transform_11, window_bounds = array<i64: 2, 1, 32>}, {pipeline_mode = #tpu.pipeline_mode<synchronous>, transform_indices = @transform_12, window_bounds = array<i64: 2, 1, 32>}, {pipeline_mode = #tpu.pipeline_mode<synchronous>, transform_indices = @transform_13, window_bounds = array<i64: 2, 1, 32>}, {pipeline_mode = #tpu.pipeline_mode<synchronous>, transform_indices = @transform_14, window_bounds = array<i64: 32, 96>}, {pipeline_mode = #tpu.pipeline_mode<synchronous>, transform_indices = @transform_15, window_bounds = array<i64: 1, 96>}, {pipeline_mode = #tpu.pipeline_mode<synchronous>, transform_indices = @transform_16, window_bounds = array<i64: 32, 32>}, {pipeline_mode = #tpu.pipeline_mode<synchronous>, transform_indices = @transform_17, window_bounds = array<i64: 1, 32>}, {pipeline_mode = #tpu.pipeline_mode<synchronous>, transform_indices = @transform_18, window_bounds = array<i64: 16, 136>}, {pipeline_mode = #tpu.pipeline_mode<synchronous>, transform_indices = @transform_19, window_bounds = array<i64: 1, 136>}, {transform_indices = @transform_20, window_bounds = array<i64: 1, 8, 8>}, {transform_indices = @transform_21, window_bounds = array<i64: 1, 8, 8, 8>}]} {
    %c0 = arith.constant 0 : index
    %c0_0 = arith.constant 0 : index
    %c0_1 = arith.constant 0 : index
    %0 = vector.load %arg1[%c0, %c0_0, %c0_1] : memref<1x8x32xf32, #tpu.memory_space<vmem>>, vector<1x8x32xf32>
    %1 = vector.shape_cast %0 : vector<1x8x32xf32> to vector<8x32xf32>
    %c0_2 = arith.constant 0 : index
    %c0_3 = arith.constant 0 : index
    %c0_4 = arith.constant 0 : index
    %2 = vector.load %arg2[%c0_2, %c0_3, %c0_4] : memref<1x1x8xf32, #tpu.memory_space<vmem>>, vector<1x1x8xf32>
    %3 = vector.shape_cast %2 : vector<1x1x8xf32> to vector<1x8xf32>
    %c0_5 = arith.constant 0 : index
    %c0_6 = arith.constant 0 : index
    %c0_7 = arith.constant 0 : index
    %4 = vector.load %arg3[%c0_5, %c0_6, %c0_7] : memref<2x32x96xf32, #tpu.memory_space<vmem>>, vector<1x32x96xf32>
    %5 = vector.shape_cast %4 : vector<1x32x96xf32> to vector<32x96xf32>
    %cst = arith.constant dense<0.000000e+00> : vector<8x96xf32>
    %6 = tpu.matmul %1, %5, %cst {dimension_numbers = #tpu.dot_dimension_numbers<[1], [0], [0], [1], [0, 0, 1, 1], [], []>} : vector<8x32xf32>, vector<32x96xf32>, vector<8x96xf32> -> vector<8x96xf32>
    %c0_8 = arith.constant 0 : index
    %c0_9 = arith.constant 0 : index
    %c0_10 = arith.constant 0 : index
    %7 = vector.load %arg4[%c0_8, %c0_9, %c0_10] : memref<2x1x96xf32, #tpu.memory_space<vmem>>, vector<1x1x96xf32>
    %8 = vector.shape_cast %7 : vector<1x1x96xf32> to vector<1x96xf32>
    %9 = vector.broadcast %8 : vector<1x96xf32> to vector<8x96xf32>
    %10 = arith.addf %6, %9 : vector<8x96xf32>
    %11 = vector.extract_strided_slice %10 {offsets = [0, 0], sizes = [8, 8], strides = [1, 1]} : vector<8x96xf32> to vector<8x8xf32>
    %12 = vector.extract_strided_slice %10 {offsets = [0, 8], sizes = [8, 8], strides = [1, 1]} : vector<8x96xf32> to vector<8x8xf32>
    %13 = vector.extract_strided_slice %10 {offsets = [0, 16], sizes = [8, 8], strides = [1, 1]} : vector<8x96xf32> to vector<8x8xf32>
    %14 = vector.extract_strided_slice %10 {offsets = [0, 24], sizes = [8, 8], strides = [1, 1]} : vector<8x96xf32> to vector<8x8xf32>
    %15 = vector.shape_cast %11 : vector<8x8xf32> to vector<1x8x8xf32>
    %16 = vector.shape_cast %12 : vector<8x8xf32> to vector<1x8x8xf32>
    %17 = vector.shape_cast %13 : vector<8x8xf32> to vector<1x8x8xf32>
    %18 = vector.shape_cast %14 : vector<8x8xf32> to vector<1x8x8xf32>
    %19 = tpu.concatenate %15, %16, %17, %18 in 0 : vector<1x8x8xf32>, vector<1x8x8xf32>, vector<1x8x8xf32>, vector<1x8x8xf32> -> vector<4x8x8xf32>
    %20 = vector.extract_strided_slice %10 {offsets = [0, 32], sizes = [8, 8], strides = [1, 1]} : vector<8x96xf32> to vector<8x8xf32>
    %21 = vector.extract_strided_slice %10 {offsets = [0, 40], sizes = [8, 8], strides = [1, 1]} : vector<8x96xf32> to vector<8x8xf32>
    %22 = vector.extract_strided_slice %10 {offsets = [0, 48], sizes = [8, 8], strides = [1, 1]} : vector<8x96xf32> to vector<8x8xf32>
    %23 = vector.extract_strided_slice %10 {offsets = [0, 56], sizes = [8, 8], strides = [1, 1]} : vector<8x96xf32> to vector<8x8xf32>
    %24 = vector.shape_cast %20 : vector<8x8xf32> to vector<1x8x8xf32>
    %25 = vector.shape_cast %21 : vector<8x8xf32> to vector<1x8x8xf32>
    %26 = vector.shape_cast %22 : vector<8x8xf32> to vector<1x8x8xf32>
    %27 = vector.shape_cast %23 : vector<8x8xf32> to vector<1x8x8xf32>
    %28 = tpu.concatenate %24, %25, %26, %27 in 0 : vector<1x8x8xf32>, vector<1x8x8xf32>, vector<1x8x8xf32>, vector<1x8x8xf32> -> vector<4x8x8xf32>
    %29 = vector.extract_strided_slice %10 {offsets = [0, 64], sizes = [8, 8], strides = [1, 1]} : vector<8x96xf32> to vector<8x8xf32>
    %30 = vector.extract_strided_slice %10 {offsets = [0, 72], sizes = [8, 8], strides = [1, 1]} : vector<8x96xf32> to vector<8x8xf32>
    %31 = vector.extract_strided_slice %10 {offsets = [0, 80], sizes = [8, 8], strides = [1, 1]} : vector<8x96xf32> to vector<8x8xf32>
    %32 = vector.extract_strided_slice %10 {offsets = [0, 88], sizes = [8, 8], strides = [1, 1]} : vector<8x96xf32> to vector<8x8xf32>
    %33 = vector.shape_cast %29 : vector<8x8xf32> to vector<1x8x8xf32>
    %34 = vector.shape_cast %30 : vector<8x8xf32> to vector<1x8x8xf32>
    %35 = vector.shape_cast %31 : vector<8x8xf32> to vector<1x8x8xf32>
    %36 = vector.shape_cast %32 : vector<8x8xf32> to vector<1x8x8xf32>
    %37 = tpu.concatenate %33, %34, %35, %36 in 0 : vector<1x8x8xf32>, vector<1x8x8xf32>, vector<1x8x8xf32>, vector<1x8x8xf32> -> vector<4x8x8xf32>
    "tpu.trace_start"() <{level = 10 : i32, message = "hqd,hkd->hqk"}> : () -> ()
    %cst_11 = arith.constant dense<0.000000e+00> : vector<4x8x8xf32>
    %38 = tpu.matmul %19, %28, %cst_11 {dimension_numbers = #tpu.dot_dimension_numbers<[2], [2], [1], [1], [0, 0, 0, 1, 1, 1], [0], [0]>} : vector<4x8x8xf32>, vector<4x8x8xf32>, vector<4x8x8xf32> -> vector<4x8x8xf32>
    "tpu.trace_stop"() : () -> ()
    %cst_12 = arith.constant 0.353553385 : f32
    %39 = vector.broadcast %cst_12 : f32 to vector<4x8x8xf32>
    %40 = arith.mulf %38, %39 : vector<4x8x8xf32>
    %41 = vector.shape_cast %3 : vector<1x8xf32> to vector<1x1x8xf32>
    %cst_13 = arith.constant 0.000000e+00 : f32
    %42 = vector.broadcast %cst_13 : f32 to vector<1x1x8xf32>
    %43 = arith.cmpf ogt, %41, %42 : vector<1x1x8xf32>
    %cst_14 = arith.constant -1.000000e+10 : f32
    %44 = vector.shape_cast %43 : vector<1x1x8xi1> to vector<1x1x8xi1>
    %45 = vector.broadcast %44 : vector<1x1x8xi1> to vector<4x8x8xi1>
    %46 = vector.broadcast %cst_14 : f32 to vector<4x8x8xf32>
    %47 = arith.select %45, %40, %46 : vector<4x8x8xi1>, vector<4x8x8xf32>
    %cst_15 = arith.constant dense<0xFF800000> : vector<4x8xf32>
    %48 = vector.multi_reduction <maximumf>, %47, %cst_15 [2] : vector<4x8x8xf32> to vector<4x8xf32>
    %49 = vector.shape_cast %48 : vector<4x8xf32> to vector<4x8x1xf32>
    %50 = vector.broadcast %49 : vector<4x8x1xf32> to vector<4x8x8xf32>
    %51 = arith.subf %47, %50 : vector<4x8x8xf32>
    %52 = math.exp %51 : vector<4x8x8xf32>
    %cst_16 = arith.constant dense<0.000000e+00> : vector<4x8xf32>
    %53 = vector.multi_reduction <add>, %52, %cst_16 [2] : vector<4x8x8xf32> to vector<4x8xf32>
    %54 = vector.shape_cast %53 : vector<4x8xf32> to vector<4x8x1xf32>
    %55 = vector.broadcast %54 : vector<4x8x1xf32> to vector<4x8x8xf32>
    %56 = arith.divf %52, %55 : vector<4x8x8xf32>
    "tpu.trace_start"() <{level = 10 : i32, message = "hqk,hkd->hqd"}> : () -> ()
    %cst_17 = arith.constant dense<0.000000e+00> : vector<4x8x8xf32>
    %57 = tpu.matmul %56, %37, %cst_17 {dimension_numbers = #tpu.dot_dimension_numbers<[2], [1], [1], [2], [0, 0, 0, 1, 1, 2], [0], [0]>} : vector<4x8x8xf32>, vector<4x8x8xf32>, vector<4x8x8xf32> -> vector<4x8x8xf32>
    "tpu.trace_stop"() : () -> ()
    %58 = vector.extract_strided_slice %57 {offsets = [0, 0, 0], sizes = [1, 8, 8], strides = [1, 1, 1]} : vector<4x8x8xf32> to vector<1x8x8xf32>
    %59 = vector.shape_cast %58 : vector<1x8x8xf32> to vector<8x8xf32>
    %60 = vector.extract_strided_slice %57 {offsets = [1, 0, 0], sizes = [1, 8, 8], strides = [1, 1, 1]} : vector<4x8x8xf32> to vector<1x8x8xf32>
    %61 = vector.shape_cast %60 : vector<1x8x8xf32> to vector<8x8xf32>
    %62 = vector.extract_strided_slice %57 {offsets = [2, 0, 0], sizes = [1, 8, 8], strides = [1, 1, 1]} : vector<4x8x8xf32> to vector<1x8x8xf32>
    %63 = vector.shape_cast %62 : vector<1x8x8xf32> to vector<8x8xf32>
    %64 = vector.extract_strided_slice %57 {offsets = [3, 0, 0], sizes = [1, 8, 8], strides = [1, 1, 1]} : vector<4x8x8xf32> to vector<1x8x8xf32>
    %65 = vector.shape_cast %64 : vector<1x8x8xf32> to vector<8x8xf32>
    %66 = tpu.concatenate %59, %61, %63, %65 in 1 : vector<8x8xf32>, vector<8x8xf32>, vector<8x8xf32>, vector<8x8xf32> -> vector<8x32xf32>
    %c0_18 = arith.constant 0 : index
    %c0_19 = arith.constant 0 : index
    %c0_20 = arith.constant 0 : index
    %67 = vector.load %arg5[%c0_18, %c0_19, %c0_20] : memref<2x32x32xf32, #tpu.memory_space<vmem>>, vector<1x32x32xf32>
    %68 = vector.shape_cast %67 : vector<1x32x32xf32> to vector<32x32xf32>
    %cst_21 = arith.constant dense<0.000000e+00> : vector<8x32xf32>
    %69 = tpu.matmul %66, %68, %cst_21 {dimension_numbers = #tpu.dot_dimension_numbers<[1], [0], [0], [1], [0, 0, 1, 1], [], []>} : vector<8x32xf32>, vector<32x32xf32>, vector<8x32xf32> -> vector<8x32xf32>
    %c0_22 = arith.constant 0 : index
    %c0_23 = arith.constant 0 : index
    %c0_24 = arith.constant 0 : index
    %70 = vector.load %arg6[%c0_22, %c0_23, %c0_24] : memref<2x1x32xf32, #tpu.memory_space<vmem>>, vector<1x1x32xf32>
    %71 = vector.shape_cast %70 : vector<1x1x32xf32> to vector<1x32xf32>
    %72 = vector.broadcast %71 : vector<1x32xf32> to vector<8x32xf32>
    %73 = arith.addf %69, %72 : vector<8x32xf32>
    %74 = arith.addf %1, %73 : vector<8x32xf32>
    %c0_25 = arith.constant 0 : index
    %c0_26 = arith.constant 0 : index
    %c0_27 = arith.constant 0 : index
    %75 = vector.load %arg7[%c0_25, %c0_26, %c0_27] : memref<2x1x32xf32, #tpu.memory_space<vmem>>, vector<1x1x32xf32>
    %76 = vector.shape_cast %75 : vector<1x1x32xf32> to vector<1x32xf32>
    %c0_28 = arith.constant 0 : index
    %c0_29 = arith.constant 0 : index
    %c0_30 = arith.constant 0 : index
    %77 = vector.load %arg8[%c0_28, %c0_29, %c0_30] : memref<2x1x32xf32, #tpu.memory_space<vmem>>, vector<1x1x32xf32>
    %78 = vector.shape_cast %77 : vector<1x1x32xf32> to vector<1x32xf32>
    %cst_31 = arith.constant dense<0.000000e+00> : vector<8xf32>
    %79 = vector.multi_reduction <add>, %74, %cst_31 [1] : vector<8x32xf32> to vector<8xf32>
    %80 = vector.shape_cast %79 : vector<8xf32> to vector<8x1xf32>
    %cst_32 = arith.constant 3.200000e+01 : f32
    %81 = vector.broadcast %cst_32 : f32 to vector<8x1xf32>
    %82 = arith.divf %80, %81 : vector<8x1xf32>
    %83 = vector.broadcast %82 : vector<8x1xf32> to vector<8x32xf32>
    %84 = arith.subf %74, %83 : vector<8x32xf32>
    %85 = arith.mulf %84, %84 : vector<8x32xf32>
    %cst_33 = arith.constant dense<0.000000e+00> : vector<8xf32>
    %86 = vector.multi_reduction <add>, %85, %cst_33 [1] : vector<8x32xf32> to vector<8xf32>
    %87 = vector.shape_cast %86 : vector<8xf32> to vector<8x1xf32>
    %cst_34 = arith.constant 3.200000e+01 : f32
    %88 = vector.broadcast %cst_34 : f32 to vector<8x1xf32>
    %89 = arith.divf %87, %88 : vector<8x1xf32>
    %90 = vector.broadcast %82 : vector<8x1xf32> to vector<8x32xf32>
    %91 = arith.subf %74, %90 : vector<8x32xf32>
    %cst_35 = arith.constant 9.99999974E-6 : f32
    %92 = vector.broadcast %cst_35 : f32 to vector<8x1xf32>
    %93 = arith.addf %89, %92 : vector<8x1xf32>
    %94 = math.rsqrt %93 : vector<8x1xf32>
    %95 = vector.broadcast %94 : vector<8x1xf32> to vector<8x32xf32>
    %96 = arith.mulf %91, %95 : vector<8x32xf32>
    %97 = vector.broadcast %76 : vector<1x32xf32> to vector<8x32xf32>
    %98 = arith.mulf %96, %97 : vector<8x32xf32>
    %99 = vector.broadcast %78 : vector<1x32xf32> to vector<8x32xf32>
    %100 = arith.addf %98, %99 : vector<8x32xf32>
    %c0_36 = arith.constant 0 : index
    %c0_37 = arith.constant 0 : index
    %c0_38 = arith.constant 0 : index
    %101 = vector.load %arg9[%c0_36, %c0_37, %c0_38] : memref<2x32x64xf32, #tpu.memory_space<vmem>>, vector<1x32x64xf32>
    %102 = vector.shape_cast %101 : vector<1x32x64xf32> to vector<32x64xf32>
    %cst_39 = arith.constant dense<0.000000e+00> : vector<8x64xf32>
    %103 = tpu.matmul %100, %102, %cst_39 {dimension_numbers = #tpu.dot_dimension_numbers<[1], [0], [0], [1], [0, 0, 1, 1], [], []>} : vector<8x32xf32>, vector<32x64xf32>, vector<8x64xf32> -> vector<8x64xf32>
    %c0_40 = arith.constant 0 : index
    %c0_41 = arith.constant 0 : index
    %c0_42 = arith.constant 0 : index
    %104 = vector.load %arg10[%c0_40, %c0_41, %c0_42] : memref<2x1x64xf32, #tpu.memory_space<vmem>>, vector<1x1x64xf32>
    %105 = vector.shape_cast %104 : vector<1x1x64xf32> to vector<1x64xf32>
    %106 = vector.broadcast %105 : vector<1x64xf32> to vector<8x64xf32>
    %107 = arith.addf %103, %106 : vector<8x64xf32>
    %cst_43 = arith.constant 0.000000e+00 : f32
    %108 = vector.broadcast %cst_43 : f32 to vector<8x64xf32>
    %109 = arith.maximumf %107, %108 : vector<8x64xf32>
    %c0_44 = arith.constant 0 : index
    %c0_45 = arith.constant 0 : index
    %c0_46 = arith.constant 0 : index
    %110 = vector.load %arg11[%c0_44, %c0_45, %c0_46] : memref<2x64x32xf32, #tpu.memory_space<vmem>>, vector<1x64x32xf32>
    %111 = vector.shape_cast %110 : vector<1x64x32xf32> to vector<64x32xf32>
    %cst_47 = arith.constant dense<0.000000e+00> : vector<8x32xf32>
    %112 = tpu.matmul %109, %111, %cst_47 {dimension_numbers = #tpu.dot_dimension_numbers<[1], [0], [0], [1], [0, 0, 1, 1], [], []>} : vector<8x64xf32>, vector<64x32xf32>, vector<8x32xf32> -> vector<8x32xf32>
    %c0_48 = arith.constant 0 : index
    %c0_49 = arith.constant 0 : index
    %c0_50 = arith.constant 0 : index
    %113 = vector.load %arg12[%c0_48, %c0_49, %c0_50] : memref<2x1x32xf32, #tpu.memory_space<vmem>>, vector<1x1x32xf32>
    %114 = vector.shape_cast %113 : vector<1x1x32xf32> to vector<1x32xf32>
    %115 = vector.broadcast %114 : vector<1x32xf32> to vector<8x32xf32>
    %116 = arith.addf %112, %115 : vector<8x32xf32>
    %117 = arith.addf %100, %116 : vector<8x32xf32>
    %c0_51 = arith.constant 0 : index
    %c0_52 = arith.constant 0 : index
    %c0_53 = arith.constant 0 : index
    %118 = vector.load %arg13[%c0_51, %c0_52, %c0_53] : memref<2x1x32xf32, #tpu.memory_space<vmem>>, vector<1x1x32xf32>
    %119 = vector.shape_cast %118 : vector<1x1x32xf32> to vector<1x32xf32>
    %c0_54 = arith.constant 0 : index
    %c0_55 = arith.constant 0 : index
    %c0_56 = arith.constant 0 : index
    %120 = vector.load %arg14[%c0_54, %c0_55, %c0_56] : memref<2x1x32xf32, #tpu.memory_space<vmem>>, vector<1x1x32xf32>
    %121 = vector.shape_cast %120 : vector<1x1x32xf32> to vector<1x32xf32>
    %cst_57 = arith.constant dense<0.000000e+00> : vector<8xf32>
    %122 = vector.multi_reduction <add>, %117, %cst_57 [1] : vector<8x32xf32> to vector<8xf32>
    %123 = vector.shape_cast %122 : vector<8xf32> to vector<8x1xf32>
    %cst_58 = arith.constant 3.200000e+01 : f32
    %124 = vector.broadcast %cst_58 : f32 to vector<8x1xf32>
    %125 = arith.divf %123, %124 : vector<8x1xf32>
    %126 = vector.broadcast %125 : vector<8x1xf32> to vector<8x32xf32>
    %127 = arith.subf %117, %126 : vector<8x32xf32>
    %128 = arith.mulf %127, %127 : vector<8x32xf32>
    %cst_59 = arith.constant dense<0.000000e+00> : vector<8xf32>
    %129 = vector.multi_reduction <add>, %128, %cst_59 [1] : vector<8x32xf32> to vector<8xf32>
    %130 = vector.shape_cast %129 : vector<8xf32> to vector<8x1xf32>
    %cst_60 = arith.constant 3.200000e+01 : f32
    %131 = vector.broadcast %cst_60 : f32 to vector<8x1xf32>
    %132 = arith.divf %130, %131 : vector<8x1xf32>
    %133 = vector.broadcast %125 : vector<8x1xf32> to vector<8x32xf32>
    %134 = arith.subf %117, %133 : vector<8x32xf32>
    %cst_61 = arith.constant 9.99999974E-6 : f32
    %135 = vector.broadcast %cst_61 : f32 to vector<8x1xf32>
    %136 = arith.addf %132, %135 : vector<8x1xf32>
    %137 = math.rsqrt %136 : vector<8x1xf32>
    %138 = vector.broadcast %137 : vector<8x1xf32> to vector<8x32xf32>
    %139 = arith.mulf %134, %138 : vector<8x32xf32>
    %140 = vector.broadcast %119 : vector<1x32xf32> to vector<8x32xf32>
    %141 = arith.mulf %139, %140 : vector<8x32xf32>
    %142 = vector.broadcast %121 : vector<1x32xf32> to vector<8x32xf32>
    %143 = arith.addf %141, %142 : vector<8x32xf32>
    %c1 = arith.constant 1 : index
    %c0_62 = arith.constant 0 : index
    %c0_63 = arith.constant 0 : index
    %144 = vector.load %arg3[%c1, %c0_62, %c0_63] : memref<2x32x96xf32, #tpu.memory_space<vmem>>, vector<1x32x96xf32>
    %145 = vector.shape_cast %144 : vector<1x32x96xf32> to vector<32x96xf32>
    %cst_64 = arith.constant dense<0.000000e+00> : vector<8x96xf32>
    %146 = tpu.matmul %143, %145, %cst_64 {dimension_numbers = #tpu.dot_dimension_numbers<[1], [0], [0], [1], [0, 0, 1, 1], [], []>} : vector<8x32xf32>, vector<32x96xf32>, vector<8x96xf32> -> vector<8x96xf32>
    %c1_65 = arith.constant 1 : index
    %c0_66 = arith.constant 0 : index
    %c0_67 = arith.constant 0 : index
    %147 = vector.load %arg4[%c1_65, %c0_66, %c0_67] : memref<2x1x96xf32, #tpu.memory_space<vmem>>, vector<1x1x96xf32>
    %148 = vector.shape_cast %147 : vector<1x1x96xf32> to vector<1x96xf32>
    %149 = vector.broadcast %148 : vector<1x96xf32> to vector<8x96xf32>
    %150 = arith.addf %146, %149 : vector<8x96xf32>
    %151 = vector.extract_strided_slice %150 {offsets = [0, 0], sizes = [8, 8], strides = [1, 1]} : vector<8x96xf32> to vector<8x8xf32>
    %152 = vector.extract_strided_slice %150 {offsets = [0, 8], sizes = [8, 8], strides = [1, 1]} : vector<8x96xf32> to vector<8x8xf32>
    %153 = vector.extract_strided_slice %150 {offsets = [0, 16], sizes = [8, 8], strides = [1, 1]} : vector<8x96xf32> to vector<8x8xf32>
    %154 = vector.extract_strided_slice %150 {offsets = [0, 24], sizes = [8, 8], strides = [1, 1]} : vector<8x96xf32> to vector<8x8xf32>
    %155 = vector.shape_cast %151 : vector<8x8xf32> to vector<1x8x8xf32>
    %156 = vector.shape_cast %152 : vector<8x8xf32> to vector<1x8x8xf32>
    %157 = vector.shape_cast %153 : vector<8x8xf32> to vector<1x8x8xf32>
    %158 = vector.shape_cast %154 : vector<8x8xf32> to vector<1x8x8xf32>
    %159 = tpu.concatenate %155, %156, %157, %158 in 0 : vector<1x8x8xf32>, vector<1x8x8xf32>, vector<1x8x8xf32>, vector<1x8x8xf32> -> vector<4x8x8xf32>
    %160 = vector.extract_strided_slice %150 {offsets = [0, 32], sizes = [8, 8], strides = [1, 1]} : vector<8x96xf32> to vector<8x8xf32>
    %161 = vector.extract_strided_slice %150 {offsets = [0, 40], sizes = [8, 8], strides = [1, 1]} : vector<8x96xf32> to vector<8x8xf32>
    %162 = vector.extract_strided_slice %150 {offsets = [0, 48], sizes = [8, 8], strides = [1, 1]} : vector<8x96xf32> to vector<8x8xf32>
    %163 = vector.extract_strided_slice %150 {offsets = [0, 56], sizes = [8, 8], strides = [1, 1]} : vector<8x96xf32> to vector<8x8xf32>
    %164 = vector.shape_cast %160 : vector<8x8xf32> to vector<1x8x8xf32>
    %165 = vector.shape_cast %161 : vector<8x8xf32> to vector<1x8x8xf32>
    %166 = vector.shape_cast %162 : vector<8x8xf32> to vector<1x8x8xf32>
    %167 = vector.shape_cast %163 : vector<8x8xf32> to vector<1x8x8xf32>
    %168 = tpu.concatenate %164, %165, %166, %167 in 0 : vector<1x8x8xf32>, vector<1x8x8xf32>, vector<1x8x8xf32>, vector<1x8x8xf32> -> vector<4x8x8xf32>
    %169 = vector.extract_strided_slice %150 {offsets = [0, 64], sizes = [8, 8], strides = [1, 1]} : vector<8x96xf32> to vector<8x8xf32>
    %170 = vector.extract_strided_slice %150 {offsets = [0, 72], sizes = [8, 8], strides = [1, 1]} : vector<8x96xf32> to vector<8x8xf32>
    %171 = vector.extract_strided_slice %150 {offsets = [0, 80], sizes = [8, 8], strides = [1, 1]} : vector<8x96xf32> to vector<8x8xf32>
    %172 = vector.extract_strided_slice %150 {offsets = [0, 88], sizes = [8, 8], strides = [1, 1]} : vector<8x96xf32> to vector<8x8xf32>
    %173 = vector.shape_cast %169 : vector<8x8xf32> to vector<1x8x8xf32>
    %174 = vector.shape_cast %170 : vector<8x8xf32> to vector<1x8x8xf32>
    %175 = vector.shape_cast %171 : vector<8x8xf32> to vector<1x8x8xf32>
    %176 = vector.shape_cast %172 : vector<8x8xf32> to vector<1x8x8xf32>
    %177 = tpu.concatenate %173, %174, %175, %176 in 0 : vector<1x8x8xf32>, vector<1x8x8xf32>, vector<1x8x8xf32>, vector<1x8x8xf32> -> vector<4x8x8xf32>
    "tpu.trace_start"() <{level = 10 : i32, message = "hqd,hkd->hqk"}> : () -> ()
    %cst_68 = arith.constant dense<0.000000e+00> : vector<4x8x8xf32>
    %178 = tpu.matmul %159, %168, %cst_68 {dimension_numbers = #tpu.dot_dimension_numbers<[2], [2], [1], [1], [0, 0, 0, 1, 1, 1], [0], [0]>} : vector<4x8x8xf32>, vector<4x8x8xf32>, vector<4x8x8xf32> -> vector<4x8x8xf32>
    "tpu.trace_stop"() : () -> ()
    %cst_69 = arith.constant 0.353553385 : f32
    %179 = vector.broadcast %cst_69 : f32 to vector<4x8x8xf32>
    %180 = arith.mulf %178, %179 : vector<4x8x8xf32>
    %181 = vector.shape_cast %3 : vector<1x8xf32> to vector<1x1x8xf32>
    %cst_70 = arith.constant 0.000000e+00 : f32
    %182 = vector.broadcast %cst_70 : f32 to vector<1x1x8xf32>
    %183 = arith.cmpf ogt, %181, %182 : vector<1x1x8xf32>
    %cst_71 = arith.constant -1.000000e+10 : f32
    %184 = vector.shape_cast %183 : vector<1x1x8xi1> to vector<1x1x8xi1>
    %185 = vector.broadcast %184 : vector<1x1x8xi1> to vector<4x8x8xi1>
    %186 = vector.broadcast %cst_71 : f32 to vector<4x8x8xf32>
    %187 = arith.select %185, %180, %186 : vector<4x8x8xi1>, vector<4x8x8xf32>
    %cst_72 = arith.constant dense<0xFF800000> : vector<4x8xf32>
    %188 = vector.multi_reduction <maximumf>, %187, %cst_72 [2] : vector<4x8x8xf32> to vector<4x8xf32>
    %189 = vector.shape_cast %188 : vector<4x8xf32> to vector<4x8x1xf32>
    %190 = vector.broadcast %189 : vector<4x8x1xf32> to vector<4x8x8xf32>
    %191 = arith.subf %187, %190 : vector<4x8x8xf32>
    %192 = math.exp %191 : vector<4x8x8xf32>
    %cst_73 = arith.constant dense<0.000000e+00> : vector<4x8xf32>
    %193 = vector.multi_reduction <add>, %192, %cst_73 [2] : vector<4x8x8xf32> to vector<4x8xf32>
    %194 = vector.shape_cast %193 : vector<4x8xf32> to vector<4x8x1xf32>
    %195 = vector.broadcast %194 : vector<4x8x1xf32> to vector<4x8x8xf32>
    %196 = arith.divf %192, %195 : vector<4x8x8xf32>
    "tpu.trace_start"() <{level = 10 : i32, message = "hqk,hkd->hqd"}> : () -> ()
    %cst_74 = arith.constant dense<0.000000e+00> : vector<4x8x8xf32>
    %197 = tpu.matmul %196, %177, %cst_74 {dimension_numbers = #tpu.dot_dimension_numbers<[2], [1], [1], [2], [0, 0, 0, 1, 1, 2], [0], [0]>} : vector<4x8x8xf32>, vector<4x8x8xf32>, vector<4x8x8xf32> -> vector<4x8x8xf32>
    "tpu.trace_stop"() : () -> ()
    %198 = vector.extract_strided_slice %197 {offsets = [0, 0, 0], sizes = [1, 8, 8], strides = [1, 1, 1]} : vector<4x8x8xf32> to vector<1x8x8xf32>
    %199 = vector.shape_cast %198 : vector<1x8x8xf32> to vector<8x8xf32>
    %200 = vector.extract_strided_slice %197 {offsets = [1, 0, 0], sizes = [1, 8, 8], strides = [1, 1, 1]} : vector<4x8x8xf32> to vector<1x8x8xf32>
    %201 = vector.shape_cast %200 : vector<1x8x8xf32> to vector<8x8xf32>
    %202 = vector.extract_strided_slice %197 {offsets = [2, 0, 0], sizes = [1, 8, 8], strides = [1, 1, 1]} : vector<4x8x8xf32> to vector<1x8x8xf32>
    %203 = vector.shape_cast %202 : vector<1x8x8xf32> to vector<8x8xf32>
    %204 = vector.extract_strided_slice %197 {offsets = [3, 0, 0], sizes = [1, 8, 8], strides = [1, 1, 1]} : vector<4x8x8xf32> to vector<1x8x8xf32>
    %205 = vector.shape_cast %204 : vector<1x8x8xf32> to vector<8x8xf32>
    %206 = tpu.concatenate %199, %201, %203, %205 in 1 : vector<8x8xf32>, vector<8x8xf32>, vector<8x8xf32>, vector<8x8xf32> -> vector<8x32xf32>
    %c1_75 = arith.constant 1 : index
    %c0_76 = arith.constant 0 : index
    %c0_77 = arith.constant 0 : index
    %207 = vector.load %arg5[%c1_75, %c0_76, %c0_77] : memref<2x32x32xf32, #tpu.memory_space<vmem>>, vector<1x32x32xf32>
    %208 = vector.shape_cast %207 : vector<1x32x32xf32> to vector<32x32xf32>
    %cst_78 = arith.constant dense<0.000000e+00> : vector<8x32xf32>
    %209 = tpu.matmul %206, %208, %cst_78 {dimension_numbers = #tpu.dot_dimension_numbers<[1], [0], [0], [1], [0, 0, 1, 1], [], []>} : vector<8x32xf32>, vector<32x32xf32>, vector<8x32xf32> -> vector<8x32xf32>
    %c1_79 = arith.constant 1 : index
    %c0_80 = arith.constant 0 : index
    %c0_81 = arith.constant 0 : index
    %210 = vector.load %arg6[%c1_79, %c0_80, %c0_81] : memref<2x1x32xf32, #tpu.memory_space<vmem>>, vector<1x1x32xf32>
    %211 = vector.shape_cast %210 : vector<1x1x32xf32> to vector<1x32xf32>
    %212 = vector.broadcast %211 : vector<1x32xf32> to vector<8x32xf32>
    %213 = arith.addf %209, %212 : vector<8x32xf32>
    %214 = arith.addf %143, %213 : vector<8x32xf32>
    %c1_82 = arith.constant 1 : index
    %c0_83 = arith.constant 0 : index
    %c0_84 = arith.constant 0 : index
    %215 = vector.load %arg7[%c1_82, %c0_83, %c0_84] : memref<2x1x32xf32, #tpu.memory_space<vmem>>, vector<1x1x32xf32>
    %216 = vector.shape_cast %215 : vector<1x1x32xf32> to vector<1x32xf32>
    %c1_85 = arith.constant 1 : index
    %c0_86 = arith.constant 0 : index
    %c0_87 = arith.constant 0 : index
    %217 = vector.load %arg8[%c1_85, %c0_86, %c0_87] : memref<2x1x32xf32, #tpu.memory_space<vmem>>, vector<1x1x32xf32>
    %218 = vector.shape_cast %217 : vector<1x1x32xf32> to vector<1x32xf32>
    %cst_88 = arith.constant dense<0.000000e+00> : vector<8xf32>
    %219 = vector.multi_reduction <add>, %214, %cst_88 [1] : vector<8x32xf32> to vector<8xf32>
    %220 = vector.shape_cast %219 : vector<8xf32> to vector<8x1xf32>
    %cst_89 = arith.constant 3.200000e+01 : f32
    %221 = vector.broadcast %cst_89 : f32 to vector<8x1xf32>
    %222 = arith.divf %220, %221 : vector<8x1xf32>
    %223 = vector.broadcast %222 : vector<8x1xf32> to vector<8x32xf32>
    %224 = arith.subf %214, %223 : vector<8x32xf32>
    %225 = arith.mulf %224, %224 : vector<8x32xf32>
    %cst_90 = arith.constant dense<0.000000e+00> : vector<8xf32>
    %226 = vector.multi_reduction <add>, %225, %cst_90 [1] : vector<8x32xf32> to vector<8xf32>
    %227 = vector.shape_cast %226 : vector<8xf32> to vector<8x1xf32>
    %cst_91 = arith.constant 3.200000e+01 : f32
    %228 = vector.broadcast %cst_91 : f32 to vector<8x1xf32>
    %229 = arith.divf %227, %228 : vector<8x1xf32>
    %230 = vector.broadcast %222 : vector<8x1xf32> to vector<8x32xf32>
    %231 = arith.subf %214, %230 : vector<8x32xf32>
    %cst_92 = arith.constant 9.99999974E-6 : f32
    %232 = vector.broadcast %cst_92 : f32 to vector<8x1xf32>
    %233 = arith.addf %229, %232 : vector<8x1xf32>
    %234 = math.rsqrt %233 : vector<8x1xf32>
    %235 = vector.broadcast %234 : vector<8x1xf32> to vector<8x32xf32>
    %236 = arith.mulf %231, %235 : vector<8x32xf32>
    %237 = vector.broadcast %216 : vector<1x32xf32> to vector<8x32xf32>
    %238 = arith.mulf %236, %237 : vector<8x32xf32>
    %239 = vector.broadcast %218 : vector<1x32xf32> to vector<8x32xf32>
    %240 = arith.addf %238, %239 : vector<8x32xf32>
    %c1_93 = arith.constant 1 : index
    %c0_94 = arith.constant 0 : index
    %c0_95 = arith.constant 0 : index
    %241 = vector.load %arg9[%c1_93, %c0_94, %c0_95] : memref<2x32x64xf32, #tpu.memory_space<vmem>>, vector<1x32x64xf32>
    %242 = vector.shape_cast %241 : vector<1x32x64xf32> to vector<32x64xf32>
    %cst_96 = arith.constant dense<0.000000e+00> : vector<8x64xf32>
    %243 = tpu.matmul %240, %242, %cst_96 {dimension_numbers = #tpu.dot_dimension_numbers<[1], [0], [0], [1], [0, 0, 1, 1], [], []>} : vector<8x32xf32>, vector<32x64xf32>, vector<8x64xf32> -> vector<8x64xf32>
    %c1_97 = arith.constant 1 : index
    %c0_98 = arith.constant 0 : index
    %c0_99 = arith.constant 0 : index
    %244 = vector.load %arg10[%c1_97, %c0_98, %c0_99] : memref<2x1x64xf32, #tpu.memory_space<vmem>>, vector<1x1x64xf32>
    %245 = vector.shape_cast %244 : vector<1x1x64xf32> to vector<1x64xf32>
    %246 = vector.broadcast %245 : vector<1x64xf32> to vector<8x64xf32>
    %247 = arith.addf %243, %246 : vector<8x64xf32>
    %cst_100 = arith.constant 0.000000e+00 : f32
    %248 = vector.broadcast %cst_100 : f32 to vector<8x64xf32>
    %249 = arith.maximumf %247, %248 : vector<8x64xf32>
    %c1_101 = arith.constant 1 : index
    %c0_102 = arith.constant 0 : index
    %c0_103 = arith.constant 0 : index
    %250 = vector.load %arg11[%c1_101, %c0_102, %c0_103] : memref<2x64x32xf32, #tpu.memory_space<vmem>>, vector<1x64x32xf32>
    %251 = vector.shape_cast %250 : vector<1x64x32xf32> to vector<64x32xf32>
    %cst_104 = arith.constant dense<0.000000e+00> : vector<8x32xf32>
    %252 = tpu.matmul %249, %251, %cst_104 {dimension_numbers = #tpu.dot_dimension_numbers<[1], [0], [0], [1], [0, 0, 1, 1], [], []>} : vector<8x64xf32>, vector<64x32xf32>, vector<8x32xf32> -> vector<8x32xf32>
    %c1_105 = arith.constant 1 : index
    %c0_106 = arith.constant 0 : index
    %c0_107 = arith.constant 0 : index
    %253 = vector.load %arg12[%c1_105, %c0_106, %c0_107] : memref<2x1x32xf32, #tpu.memory_space<vmem>>, vector<1x1x32xf32>
    %254 = vector.shape_cast %253 : vector<1x1x32xf32> to vector<1x32xf32>
    %255 = vector.broadcast %254 : vector<1x32xf32> to vector<8x32xf32>
    %256 = arith.addf %252, %255 : vector<8x32xf32>
    %257 = arith.addf %240, %256 : vector<8x32xf32>
    %c1_108 = arith.constant 1 : index
    %c0_109 = arith.constant 0 : index
    %c0_110 = arith.constant 0 : index
    %258 = vector.load %arg13[%c1_108, %c0_109, %c0_110] : memref<2x1x32xf32, #tpu.memory_space<vmem>>, vector<1x1x32xf32>
    %259 = vector.shape_cast %258 : vector<1x1x32xf32> to vector<1x32xf32>
    %c1_111 = arith.constant 1 : index
    %c0_112 = arith.constant 0 : index
    %c0_113 = arith.constant 0 : index
    %260 = vector.load %arg14[%c1_111, %c0_112, %c0_113] : memref<2x1x32xf32, #tpu.memory_space<vmem>>, vector<1x1x32xf32>
    %261 = vector.shape_cast %260 : vector<1x1x32xf32> to vector<1x32xf32>
    %cst_114 = arith.constant dense<0.000000e+00> : vector<8xf32>
    %262 = vector.multi_reduction <add>, %257, %cst_114 [1] : vector<8x32xf32> to vector<8xf32>
    %263 = vector.shape_cast %262 : vector<8xf32> to vector<8x1xf32>
    %cst_115 = arith.constant 3.200000e+01 : f32
    %264 = vector.broadcast %cst_115 : f32 to vector<8x1xf32>
    %265 = arith.divf %263, %264 : vector<8x1xf32>
    %266 = vector.broadcast %265 : vector<8x1xf32> to vector<8x32xf32>
    %267 = arith.subf %257, %266 : vector<8x32xf32>
    %268 = arith.mulf %267, %267 : vector<8x32xf32>
    %cst_116 = arith.constant dense<0.000000e+00> : vector<8xf32>
    %269 = vector.multi_reduction <add>, %268, %cst_116 [1] : vector<8x32xf32> to vector<8xf32>
    %270 = vector.shape_cast %269 : vector<8xf32> to vector<8x1xf32>
    %cst_117 = arith.constant 3.200000e+01 : f32
    %271 = vector.broadcast %cst_117 : f32 to vector<8x1xf32>
    %272 = arith.divf %270, %271 : vector<8x1xf32>
    %273 = vector.broadcast %265 : vector<8x1xf32> to vector<8x32xf32>
    %274 = arith.subf %257, %273 : vector<8x32xf32>
    %cst_118 = arith.constant 9.99999974E-6 : f32
    %275 = vector.broadcast %cst_118 : f32 to vector<8x1xf32>
    %276 = arith.addf %272, %275 : vector<8x1xf32>
    %277 = math.rsqrt %276 : vector<8x1xf32>
    %278 = vector.broadcast %277 : vector<8x1xf32> to vector<8x32xf32>
    %279 = arith.mulf %274, %278 : vector<8x32xf32>
    %280 = vector.broadcast %259 : vector<1x32xf32> to vector<8x32xf32>
    %281 = arith.mulf %279, %280 : vector<8x32xf32>
    %282 = vector.broadcast %261 : vector<1x32xf32> to vector<8x32xf32>
    %283 = arith.addf %281, %282 : vector<8x32xf32>
    %c0_119 = arith.constant 0 : index
    %c0_120 = arith.constant 0 : index
    %284 = vector.load %arg15[%c0_119, %c0_120] : memref<32x96xf32, #tpu.memory_space<vmem>>, vector<32x96xf32>
    %cst_121 = arith.constant dense<0.000000e+00> : vector<8x96xf32>
    %285 = tpu.matmul %283, %284, %cst_121 {dimension_numbers = #tpu.dot_dimension_numbers<[1], [0], [0], [1], [0, 0, 1, 1], [], []>} : vector<8x32xf32>, vector<32x96xf32>, vector<8x96xf32> -> vector<8x96xf32>
    %c0_122 = arith.constant 0 : index
    %c0_123 = arith.constant 0 : index
    %286 = vector.load %arg16[%c0_122, %c0_123] : memref<1x96xf32, #tpu.memory_space<vmem>>, vector<1x96xf32>
    %287 = vector.broadcast %286 : vector<1x96xf32> to vector<8x96xf32>
    %288 = arith.addf %285, %287 : vector<8x96xf32>
    %cst_124 = arith.constant 0.000000e+00 : f32
    %289 = vector.broadcast %cst_124 : f32 to vector<8x96xf32>
    %290 = arith.cmpf ogt, %288, %289 : vector<8x96xf32>
    %cst_125 = arith.constant 1.000000e-01 : f32
    %291 = vector.broadcast %cst_125 : f32 to vector<8x96xf32>
    %292 = arith.mulf %291, %288 : vector<8x96xf32>
    %293 = arith.select %290, %288, %292 : vector<8x96xi1>, vector<8x96xf32>
    %294 = vector.extract_strided_slice %293 {offsets = [0, 0], sizes = [8, 32], strides = [1, 1]} : vector<8x96xf32> to vector<8x32xf32>
    %295 = vector.extract_strided_slice %293 {offsets = [0, 32], sizes = [8, 32], strides = [1, 1]} : vector<8x96xf32> to vector<8x32xf32>
    %296 = vector.extract_strided_slice %293 {offsets = [0, 64], sizes = [8, 16], strides = [1, 1]} : vector<8x96xf32> to vector<8x16xf32>
    %297 = vector.extract_strided_slice %293 {offsets = [0, 80], sizes = [8, 16], strides = [1, 1]} : vector<8x96xf32> to vector<8x16xf32>
    %c0_126 = arith.constant 0 : index
    %c0_127 = arith.constant 0 : index
    %298 = vector.load %arg17[%c0_126, %c0_127] : memref<32x32xf32, #tpu.memory_space<vmem>>, vector<32x32xf32>
    %cst_128 = arith.constant dense<0.000000e+00> : vector<8x32xf32>
    %299 = tpu.matmul %295, %298, %cst_128 {dimension_numbers = #tpu.dot_dimension_numbers<[1], [0], [0], [1], [0, 0, 1, 1], [], []>} : vector<8x32xf32>, vector<32x32xf32>, vector<8x32xf32> -> vector<8x32xf32>
    %c0_129 = arith.constant 0 : index
    %c0_130 = arith.constant 0 : index
    %300 = vector.load %arg18[%c0_129, %c0_130] : memref<1x32xf32, #tpu.memory_space<vmem>>, vector<1x32xf32>
    %301 = vector.broadcast %300 : vector<1x32xf32> to vector<8x32xf32>
    %302 = arith.addf %299, %301 : vector<8x32xf32>
    %cst_131 = arith.constant dense<0.000000e+00> : vector<8x8xf32>
    %303 = tpu.matmul %302, %294, %cst_131 {dimension_numbers = #tpu.dot_dimension_numbers<[1], [1], [0], [0], [0, 0, 1, 0], [], []>} : vector<8x32xf32>, vector<8x32xf32>, vector<8x8xf32> -> vector<8x8xf32>
    %cst_132 = arith.constant 0.000000e+00 : f32
    %304 = vector.broadcast %cst_132 : f32 to vector<1x8xf32>
    %305 = arith.cmpf ogt, %3, %304 : vector<1x8xf32>
    %cst_133 = arith.constant 0xFF800000 : f32
    %306 = vector.shape_cast %305 : vector<1x8xi1> to vector<1x8xi1>
    %307 = vector.broadcast %306 : vector<1x8xi1> to vector<8x8xi1>
    %308 = vector.broadcast %cst_133 : f32 to vector<8x8xf32>
    %309 = arith.select %307, %303, %308 : vector<8x8xi1>, vector<8x8xf32>
    %c0_134 = arith.constant 0 : index
    %c0_135 = arith.constant 0 : index
    %c0_136 = arith.constant 0 : index
    %310 = vector.load %arg21[%c0_134, %c0_135, %c0_136] : memref<1x8x8xf32, #tpu.memory_space<vmem>>, vector<1x8x8xf32>
    %311 = vector.shape_cast %310 : vector<1x8x8xf32> to vector<8x8xf32>
    %312 = vector.shape_cast %309 : vector<8x8xf32> to vector<1x8x8xf32>
    tpu.vector_store %arg21[%c0_134, %c0_135, %c0_136], %312 {strides = array<i32>} : memref<1x8x8xf32, #tpu.memory_space<vmem>>, vector<1x8x8xf32>,
    %c0_137 = arith.constant 0 : index
    %c0_138 = arith.constant 0 : index
    %313 = vector.load %arg19[%c0_137, %c0_138] : memref<16x136xf32, #tpu.memory_space<vmem>>, vector<16x136xf32>
    %cst_139 = arith.constant dense<0.000000e+00> : vector<8x136xf32>
    %314 = tpu.matmul %297, %313, %cst_139 {dimension_numbers = #tpu.dot_dimension_numbers<[1], [0], [0], [1], [0, 0, 1, 1], [], []>} : vector<8x16xf32>, vector<16x136xf32>, vector<8x136xf32> -> vector<8x136xf32>
    %c0_140 = arith.constant 0 : index
    %c0_141 = arith.constant 0 : index
    %315 = vector.load %arg20[%c0_140, %c0_141] : memref<1x136xf32, #tpu.memory_space<vmem>>, vector<1x136xf32>
    %316 = vector.broadcast %315 : vector<1x136xf32> to vector<8x136xf32>
    %317 = arith.addf %314, %316 : vector<8x136xf32>
    %318 = vector.extract_strided_slice %317 {offsets = [0, 0], sizes = [8, 17], strides = [1, 1]} : vector<8x136xf32> to vector<8x17xf32>
    %319 = vector.extract_strided_slice %318 {offsets = [0, 0], sizes = [8, 16], strides = [1, 1]} : vector<8x17xf32> to vector<8x16xf32>
    %cst_142 = arith.constant dense<0.000000e+00> : vector<8x8xf32>
    %320 = tpu.matmul %319, %296, %cst_142 {dimension_numbers = #tpu.dot_dimension_numbers<[1], [1], [0], [0], [0, 0, 1, 0], [], []>} : vector<8x16xf32>, vector<8x16xf32>, vector<8x8xf32> -> vector<8x8xf32>
    %321 = vector.extract_strided_slice %318 {offsets = [0, 16], sizes = [8, 1], strides = [1, 1]} : vector<8x17xf32> to vector<8x1xf32>
    %322 = vector.broadcast %321 : vector<8x1xf32> to vector<8x8xf32>
    %323 = arith.addf %320, %322 : vector<8x8xf32>
    %c0_143 = arith.constant 0 : index
    %c0_144 = arith.constant 0 : index
    %c0_145 = arith.constant 0 : index
    %c0_146 = arith.constant 0 : index
    %324 = vector.load %arg22[%c0_143, %c0_144, %c0_145, %c0_146] : memref<1x8x8x8xf32, #tpu.memory_space<vmem>>, vector<1x1x8x8xf32>
    %325 = vector.shape_cast %324 : vector<1x1x8x8xf32> to vector<8x8xf32>
    %326 = vector.shape_cast %323 : vector<8x8xf32> to vector<1x1x8x8xf32>
    tpu.vector_store %arg22[%c0_143, %c0_144, %c0_145, %c0_146], %326 {strides = array<i32>} : memref<1x8x8x8xf32, #tpu.memory_space<vmem>>, vector<1x1x8x8xf32>,
    %327 = vector.extract_strided_slice %317 {offsets = [0, 17], sizes = [8, 17], strides = [1, 1]} : vector<8x136xf32> to vector<8x17xf32>
    %328 = vector.extract_strided_slice %327 {offsets = [0, 0], sizes = [8, 16], strides = [1, 1]} : vector<8x17xf32> to vector<8x16xf32>
    %cst_147 = arith.constant dense<0.000000e+00> : vector<8x8xf32>
    %329 = tpu.matmul %328, %296, %cst_147 {dimension_numbers = #tpu.dot_dimension_numbers<[1], [1], [0], [0], [0, 0, 1, 0], [], []>} : vector<8x16xf32>, vector<8x16xf32>, vector<8x8xf32> -> vector<8x8xf32>
    %330 = vector.extract_strided_slice %327 {offsets = [0, 16], sizes = [8, 1], strides = [1, 1]} : vector<8x17xf32> to vector<8x1xf32>
    %331 = vector.broadcast %330 : vector<8x1xf32> to vector<8x8xf32>
    %332 = arith.addf %329, %331 : vector<8x8xf32>
    %c0_148 = arith.constant 0 : index
    %c1_149 = arith.constant 1 : index
    %c0_150 = arith.constant 0 : index
    %c0_151 = arith.constant 0 : index
    %333 = vector.load %arg22[%c0_148, %c1_149, %c0_150, %c0_151] : memref<1x8x8x8xf32, #tpu.memory_space<vmem>>, vector<1x1x8x8xf32>
    %334 = vector.shape_cast %333 : vector<1x1x8x8xf32> to vector<8x8xf32>
    %335 = vector.shape_cast %332 : vector<8x8xf32> to vector<1x1x8x8xf32>
    tpu.vector_store %arg22[%c0_148, %c1_149, %c0_150, %c0_151], %335 {strides = array<i32>} : memref<1x8x8x8xf32, #tpu.memory_space<vmem>>, vector<1x1x8x8xf32>,
    %336 = vector.extract_strided_slice %317 {offsets = [0, 34], sizes = [8, 17], strides = [1, 1]} : vector<8x136xf32> to vector<8x17xf32>
    %337 = vector.extract_strided_slice %336 {offsets = [0, 0], sizes = [8, 16], strides = [1, 1]} : vector<8x17xf32> to vector<8x16xf32>
    %cst_152 = arith.constant dense<0.000000e+00> : vector<8x8xf32>
    %338 = tpu.matmul %337, %296, %cst_152 {dimension_numbers = #tpu.dot_dimension_numbers<[1], [1], [0], [0], [0, 0, 1, 0], [], []>} : vector<8x16xf32>, vector<8x16xf32>, vector<8x8xf32> -> vector<8x8xf32>
    %339 = vector.extract_strided_slice %336 {offsets = [0, 16], sizes = [8, 1], strides = [1, 1]} : vector<8x17xf32> to vector<8x1xf32>
    %340 = vector.broadcast %339 : vector<8x1xf32> to vector<8x8xf32>
    %341 = arith.addf %338, %340 : vector<8x8xf32>
    %c0_153 = arith.constant 0 : index
    %c2 = arith.constant 2 : index
    %c0_154 = arith.constant 0 : index
    %c0_155 = arith.constant 0 : index
    %342 = vector.load %arg22[%c0_153, %c2, %c0_154, %c0_155] : memref<1x8x8x8xf32, #tpu.memory_space<vmem>>, vector<1x1x8x8xf32>
    %343 = vector.shape_cast %342 : vector<1x1x8x8xf32> to vector<8x8xf32>
    %344 = vector.shape_cast %341 : vector<8x8xf32> to vector<1x1x8x8xf32>
    tpu.vector_store %arg22[%c0_153, %c2, %c0_154, %c0_155], %344 {strides = array<i32>} : memref<1x8x8x8xf32, #tpu.memory_space<vmem>>, vector<1x1x8x8xf32>,
    %345 = vector.extract_strided_slice %317 {offsets = [0, 51], sizes = [8, 17], strides = [1, 1]} : vector<8x136xf32> to vector<8x17xf32>
    %346 = vector.extract_strided_slice %345 {offsets = [0, 0], sizes = [8, 16], strides = [1, 1]} : vector<8x17xf32> to vector<8x16xf32>
    %cst_156 = arith.constant dense<0.000000e+00> : vector<8x8xf32>
    %347 = tpu.matmul %346, %296, %cst_156 {dimension_numbers = #tpu.dot_dimension_numbers<[1], [1], [0], [0], [0, 0, 1, 0], [], []>} : vector<8x16xf32>, vector<8x16xf32>, vector<8x8xf32> -> vector<8x8xf32>
    %348 = vector.extract_strided_slice %345 {offsets = [0, 16], sizes = [8, 1], strides = [1, 1]} : vector<8x17xf32> to vector<8x1xf32>
    %349 = vector.broadcast %348 : vector<8x1xf32> to vector<8x8xf32>
    %350 = arith.addf %347, %349 : vector<8x8xf32>
    %c0_157 = arith.constant 0 : index
    %c3 = arith.constant 3 : index
    %c0_158 = arith.constant 0 : index
    %c0_159 = arith.constant 0 : index
    %351 = vector.load %arg22[%c0_157, %c3, %c0_158, %c0_159] : memref<1x8x8x8xf32, #tpu.memory_space<vmem>>, vector<1x1x8x8xf32>
    %352 = vector.shape_cast %351 : vector<1x1x8x8xf32> to vector<8x8xf32>
    %353 = vector.shape_cast %350 : vector<8x8xf32> to vector<1x1x8x8xf32>
    tpu.vector_store %arg22[%c0_157, %c3, %c0_158, %c0_159], %353 {strides = array<i32>} : memref<1x8x8x8xf32, #tpu.memory_space<vmem>>, vector<1x1x8x8xf32>,
    %354 = vector.extract_strided_slice %317 {offsets = [0, 68], sizes = [8, 17], strides = [1, 1]} : vector<8x136xf32> to vector<8x17xf32>
    %355 = vector.extract_strided_slice %354 {offsets = [0, 0], sizes = [8, 16], strides = [1, 1]} : vector<8x17xf32> to vector<8x16xf32>
    %cst_160 = arith.constant dense<0.000000e+00> : vector<8x8xf32>
    %356 = tpu.matmul %355, %296, %cst_160 {dimension_numbers = #tpu.dot_dimension_numbers<[1], [1], [0], [0], [0, 0, 1, 0], [], []>} : vector<8x16xf32>, vector<8x16xf32>, vector<8x8xf32> -> vector<8x8xf32>
    %357 = vector.extract_strided_slice %354 {offsets = [0, 16], sizes = [8, 1], strides = [1, 1]} : vector<8x17xf32> to vector<8x1xf32>
    %358 = vector.broadcast %357 : vector<8x1xf32> to vector<8x8xf32>
    %359 = arith.addf %356, %358 : vector<8x8xf32>
    %c0_161 = arith.constant 0 : index
    %c4 = arith.constant 4 : index
    %c0_162 = arith.constant 0 : index
    %c0_163 = arith.constant 0 : index
    %360 = vector.load %arg22[%c0_161, %c4, %c0_162, %c0_163] : memref<1x8x8x8xf32, #tpu.memory_space<vmem>>, vector<1x1x8x8xf32>
    %361 = vector.shape_cast %360 : vector<1x1x8x8xf32> to vector<8x8xf32>
    %362 = vector.shape_cast %359 : vector<8x8xf32> to vector<1x1x8x8xf32>
    tpu.vector_store %arg22[%c0_161, %c4, %c0_162, %c0_163], %362 {strides = array<i32>} : memref<1x8x8x8xf32, #tpu.memory_space<vmem>>, vector<1x1x8x8xf32>,
    %363 = vector.extract_strided_slice %317 {offsets = [0, 85], sizes = [8, 17], strides = [1, 1]} : vector<8x136xf32> to vector<8x17xf32>
    %364 = vector.extract_strided_slice %363 {offsets = [0, 0], sizes = [8, 16], strides = [1, 1]} : vector<8x17xf32> to vector<8x16xf32>
    %cst_164 = arith.constant dense<0.000000e+00> : vector<8x8xf32>
    %365 = tpu.matmul %364, %296, %cst_164 {dimension_numbers = #tpu.dot_dimension_numbers<[1], [1], [0], [0], [0, 0, 1, 0], [], []>} : vector<8x16xf32>, vector<8x16xf32>, vector<8x8xf32> -> vector<8x8xf32>
    %366 = vector.extract_strided_slice %363 {offsets = [0, 16], sizes = [8, 1], strides = [1, 1]} : vector<8x17xf32> to vector<8x1xf32>
    %367 = vector.broadcast %366 : vector<8x1xf32> to vector<8x8xf32>
    %368 = arith.addf %365, %367 : vector<8x8xf32>
    %c0_165 = arith.constant 0 : index
    %c5 = arith.constant 5 : index
    %c0_166 = arith.constant 0 : index
    %c0_167 = arith.constant 0 : index
    %369 = vector.load %arg22[%c0_165, %c5, %c0_166, %c0_167] : memref<1x8x8x8xf32, #tpu.memory_space<vmem>>, vector<1x1x8x8xf32>
    %370 = vector.shape_cast %369 : vector<1x1x8x8xf32> to vector<8x8xf32>
    %371 = vector.shape_cast %368 : vector<8x8xf32> to vector<1x1x8x8xf32>
    tpu.vector_store %arg22[%c0_165, %c5, %c0_166, %c0_167], %371 {strides = array<i32>} : memref<1x8x8x8xf32, #tpu.memory_space<vmem>>, vector<1x1x8x8xf32>,
    %372 = vector.extract_strided_slice %317 {offsets = [0, 102], sizes = [8, 17], strides = [1, 1]} : vector<8x136xf32> to vector<8x17xf32>
    %373 = vector.extract_strided_slice %372 {offsets = [0, 0], sizes = [8, 16], strides = [1, 1]} : vector<8x17xf32> to vector<8x16xf32>
    %cst_168 = arith.constant dense<0.000000e+00> : vector<8x8xf32>
    %374 = tpu.matmul %373, %296, %cst_168 {dimension_numbers = #tpu.dot_dimension_numbers<[1], [1], [0], [0], [0, 0, 1, 0], [], []>} : vector<8x16xf32>, vector<8x16xf32>, vector<8x8xf32> -> vector<8x8xf32>
    %375 = vector.extract_strided_slice %372 {offsets = [0, 16], sizes = [8, 1], strides = [1, 1]} : vector<8x17xf32> to vector<8x1xf32>
    %376 = vector.broadcast %375 : vector<8x1xf32> to vector<8x8xf32>
    %377 = arith.addf %374, %376 : vector<8x8xf32>
    %c0_169 = arith.constant 0 : index
    %c6 = arith.constant 6 : index
    %c0_170 = arith.constant 0 : index
    %c0_171 = arith.constant 0 : index
    %378 = vector.load %arg22[%c0_169, %c6, %c0_170, %c0_171] : memref<1x8x8x8xf32, #tpu.memory_space<vmem>>, vector<1x1x8x8xf32>
    %379 = vector.shape_cast %378 : vector<1x1x8x8xf32> to vector<8x8xf32>
    %380 = vector.shape_cast %377 : vector<8x8xf32> to vector<1x1x8x8xf32>
    tpu.vector_store %arg22[%c0_169, %c6, %c0_170, %c0_171], %380 {strides = array<i32>} : memref<1x8x8x8xf32, #tpu.memory_space<vmem>>, vector<1x1x8x8xf32>,
    %381 = vector.extract_strided_slice %317 {offsets = [0, 119], sizes = [8, 17], strides = [1, 1]} : vector<8x136xf32> to vector<8x17xf32>
    %382 = vector.extract_strided_slice %381 {offsets = [0, 0], sizes = [8, 16], strides = [1, 1]} : vector<8x17xf32> to vector<8x16xf32>
    %cst_172 = arith.constant dense<0.000000e+00> : vector<8x8xf32>
    %383 = tpu.matmul %382, %296, %cst_172 {dimension_numbers = #tpu.dot_dimension_numbers<[1], [1], [0], [0], [0, 0, 1, 0], [], []>} : vector<8x16xf32>, vector<8x16xf32>, vector<8x8xf32> -> vector<8x8xf32>
    %384 = vector.extract_strided_slice %381 {offsets = [0, 16], sizes = [8, 1], strides = [1, 1]} : vector<8x17xf32> to vector<8x1xf32>
    %385 = vector.broadcast %384 : vector<8x1xf32> to vector<8x8xf32>
    %386 = arith.addf %383, %385 : vector<8x8xf32>
    %c0_173 = arith.constant 0 : index
    %c7 = arith.constant 7 : index
    %c0_174 = arith.constant 0 : index
    %c0_175 = arith.constant 0 : index
    %387 = vector.load %arg22[%c0_173, %c7, %c0_174, %c0_175] : memref<1x8x8x8xf32, #tpu.memory_space<vmem>>, vector<1x1x8x8xf32>
    %388 = vector.shape_cast %387 : vector<1x1x8x8xf32> to vector<8x8xf32>
    %389 = vector.shape_cast %386 : vector<8x8xf32> to vector<1x1x8x8xf32>
    tpu.vector_store %arg22[%c0_173, %c7, %c0_174, %c0_175], %389 {strides = array<i32>} : memref<1x8x8x8xf32, #tpu.memory_space<vmem>>, vector<1x1x8x8xf32>,
    return
  }
  func.func @transform_0(%arg0: i32) -> (i32, i32, i32) {
    %c0_i32 = arith.constant 0 : i32
    %c0_i32_0 = arith.constant 0 : i32
    %c0_i32_1 = arith.constant 0 : i32
    return %arg0, %c0_i32, %c0_i32_0 : i32, i32, i32
  }
  func.func @transform_1(%arg0: i32) -> (i32, i32, i32) {
    %c0_i32 = arith.constant 0 : i32
    %c0_i32_0 = arith.constant 0 : i32
    %c0_i32_1 = arith.constant 0 : i32
    return %arg0, %c0_i32, %c0_i32_0 : i32, i32, i32
  }
  func.func @transform_2(%arg0: i32) -> (i32, i32, i32) {
    %c0_i32 = arith.constant 0 : i32
    %c0_i32_0 = arith.constant 0 : i32
    %c0_i32_1 = arith.constant 0 : i32
    %c0_i32_2 = arith.constant 0 : i32
    return %c0_i32, %c0_i32_0, %c0_i32_1 : i32, i32, i32
  }
  func.func @transform_3(%arg0: i32) -> (i32, i32, i32) {
    %c0_i32 = arith.constant 0 : i32
    %c0_i32_0 = arith.constant 0 : i32
    %c0_i32_1 = arith.constant 0 : i32
    %c0_i32_2 = arith.constant 0 : i32
    return %c0_i32, %c0_i32_0, %c0_i32_1 : i32, i32, i32
  }
  func.func @transform_4(%arg0: i32) -> (i32, i32, i32) {
    %c0_i32 = arith.constant 0 : i32
    %c0_i32_0 = arith.constant 0 : i32
    %c0_i32_1 = arith.constant 0 : i32
    %c0_i32_2 = arith.constant 0 : i32
    return %c0_i32, %c0_i32_0, %c0_i32_1 : i32, i32, i32
  }
  func.func @transform_5(%arg0: i32) -> (i32, i32, i32) {
    %c0_i32 = arith.constant 0 : i32
    %c0_i32_0 = arith.constant 0 : i32
    %c0_i32_1 = arith.constant 0 : i32
    %c0_i32_2 = arith.constant 0 : i32
    return %c0_i32, %c0_i32_0, %c0_i32_1 : i32, i32, i32
  }
  func.func @transform_6(%arg0: i32) -> (i32, i32, i32) {
    %c0_i32 = arith.constant 0 : i32
    %c0_i32_0 = arith.constant 0 : i32
    %c0_i32_1 = arith.constant 0 : i32
    %c0_i32_2 = arith.constant 0 : i32
    return %c0_i32, %c0_i32_0, %c0_i32_1 : i32, i32, i32
  }
  func.func @transform_7(%arg0: i32) -> (i32, i32, i32) {
    %c0_i32 = arith.constant 0 : i32
    %c0_i32_0 = arith.constant 0 : i32
    %c0_i32_1 = arith.constant 0 : i32
    %c0_i32_2 = arith.constant 0 : i32
    return %c0_i32, %c0_i32_0, %c0_i32_1 : i32, i32, i32
  }
  func.func @transform_8(%arg0: i32) -> (i32, i32, i32) {
    %c0_i32 = arith.constant 0 : i32
    %c0_i32_0 = arith.constant 0 : i32
    %c0_i32_1 = arith.constant 0 : i32
    %c0_i32_2 = arith.constant 0 : i32
    return %c0_i32, %c0_i32_0, %c0_i32_1 : i32, i32, i32
  }
  func.func @transform_9(%arg0: i32) -> (i32, i32, i32) {
    %c0_i32 = arith.constant 0 : i32
    %c0_i32_0 = arith.constant 0 : i32
    %c0_i32_1 = arith.constant 0 : i32
    %c0_i32_2 = arith.constant 0 : i32
    return %c0_i32, %c0_i32_0, %c0_i32_1 : i32, i32, i32
  }
  func.func @transform_10(%arg0: i32) -> (i32, i32, i32) {
    %c0_i32 = arith.constant 0 : i32
    %c0_i32_0 = arith.constant 0 : i32
    %c0_i32_1 = arith.constant 0 : i32
    %c0_i32_2 = arith.constant 0 : i32
    return %c0_i32, %c0_i32_0, %c0_i32_1 : i32, i32, i32
  }
  func.func @transform_11(%arg0: i32) -> (i32, i32, i32) {
    %c0_i32 = arith.constant 0 : i32
    %c0_i32_0 = arith.constant 0 : i32
    %c0_i32_1 = arith.constant 0 : i32
    %c0_i32_2 = arith.constant 0 : i32
    return %c0_i32, %c0_i32_0, %c0_i32_1 : i32, i32, i32
  }
  func.func @transform_12(%arg0: i32) -> (i32, i32, i32) {
    %c0_i32 = arith.constant 0 : i32
    %c0_i32_0 = arith.constant 0 : i32
    %c0_i32_1 = arith.constant 0 : i32
    %c0_i32_2 = arith.constant 0 : i32
    return %c0_i32, %c0_i32_0, %c0_i32_1 : i32, i32, i32
  }
  func.func @transform_13(%arg0: i32) -> (i32, i32, i32) {
    %c0_i32 = arith.constant 0 : i32
    %c0_i32_0 = arith.constant 0 : i32
    %c0_i32_1 = arith.constant 0 : i32
    %c0_i32_2 = arith.constant 0 : i32
    return %c0_i32, %c0_i32_0, %c0_i32_1 : i32, i32, i32
  }
  func.func @transform_14(%arg0: i32) -> (i32, i32) {
    %c0_i32 = arith.constant 0 : i32
    %c0_i32_0 = arith.constant 0 : i32
    %c0_i32_1 = arith.constant 0 : i32
    return %c0_i32, %c0_i32_0 : i32, i32
  }
  func.func @transform_15(%arg0: i32) -> (i32, i32) {
    %c0_i32 = arith.constant 0 : i32
    %c0_i32_0 = arith.constant 0 : i32
    %c0_i32_1 = arith.constant 0 : i32
    return %c0_i32, %c0_i32_0 : i32, i32
  }
  func.func @transform_16(%arg0: i32) -> (i32, i32) {
    %c0_i32 = arith.constant 0 : i32
    %c0_i32_0 = arith.constant 0 : i32
    %c0_i32_1 = arith.constant 0 : i32
    return %c0_i32, %c0_i32_0 : i32, i32
  }
  func.func @transform_17(%arg0: i32) -> (i32, i32) {
    %c0_i32 = arith.constant 0 : i32
    %c0_i32_0 = arith.constant 0 : i32
    %c0_i32_1 = arith.constant 0 : i32
    return %c0_i32, %c0_i32_0 : i32, i32
  }
  func.func @transform_18(%arg0: i32) -> (i32, i32) {
    %c0_i32 = arith.constant 0 : i32
    %c0_i32_0 = arith.constant 0 : i32
    %c0_i32_1 = arith.constant 0 : i32
    return %c0_i32, %c0_i32_0 : i32, i32
  }
  func.func @transform_19(%arg0: i32) -> (i32, i32) {
    %c0_i32 = arith.constant 0 : i32
    %c0_i32_0 = arith.constant 0 : i32
    %c0_i32_1 = arith.constant 0 : i32
    return %c0_i32, %c0_i32_0 : i32, i32
  }
  func.func @transform_20(%arg0: i32) -> (i32, i32, i32) {
    %c0_i32 = arith.constant 0 : i32
    %c0_i32_0 = arith.constant 0 : i32
    %c0_i32_1 = arith.constant 0 : i32
    return %arg0, %c0_i32, %c0_i32_0 : i32, i32, i32
  }
  func.func @transform_21(%arg0: i32) -> (i32, i32, i32, i32) {
    %c0_i32 = arith.constant 0 : i32
    %c0_i32_0 = arith.constant 0 : i32
    %c0_i32_1 = arith.constant 0 : i32
    %c0_i32_2 = arith.constant 0 : i32
    return %arg0, %c0_i32, %c0_i32_0, %c0_i32_1 : i32, i32, i32, i32
  }
}

</mosaic_0001>

<bundles_post_ra>
// kernel: _lambda_.1
= control target key start
LH: loop header
LB: loop body
LE: loop exit
PB: predicated region body
PF: predicated region fallthrough
CT: control target
= control target key end

     0   :  { %s3289_s0 = inlined_call_operand.vmem [shape: f32[2,8,32], index: 0, kind: input, shape index: {}]   ;;  %s3290_s1 = inlined_call_operand.vmem [shape: f32[2,1,8], index: 1, kind: input, shape index: {}]   ;;  %s3291_s2 = inlined_call_operand.vmem [shape: f32[2,32,96], index: 2, kind: input, shape index: {}]   ;;  %s3292_s3 = inlined_call_operand.vmem [shape: f32[2,1,96], index: 3, kind: input, shape index: {}]   ;;  %s3293_s4 = inlined_call_operand.vmem [shape: f32[2,32,32], index: 4, kind: input, shape index: {}]   ;;  %s3294_s5 = inlined_call_operand.vmem [shape: f32[2,1,32], index: 5, kind: input, shape index: {}]   ;;  %s3295_s6 = inlined_call_operand.vmem [shape: f32[2,1,32], index: 6, kind: input, shape index: {}]   ;;  %s3296_s7 = inlined_call_operand.vmem [shape: f32[2,1,32], index: 7, kind: input, shape index: {}]   ;;  %s3297_s8 = inlined_call_operand.vmem [shape: f32[2,32,64], index: 8, kind: input, shape index: {}]   ;;  %s3298_s9 = inlined_call_operand.vmem [shape: f32[2,1,64], index: 9, kind: input, shape index: {}]   ;;  %s3299_s10 = inlined_call_operand.vmem [shape: f32[2,64,32], index: 10, kind: input, shape index: {}]   ;;  %s3300_s11 = inlined_call_operand.vmem [shape: f32[2,1,32], index: 11, kind: input, shape index: {}]   ;;  %s3301_s12 = inlined_call_operand.vmem [shape: f32[2,1,32], index: 12, kind: input, shape index: {}]   ;;  %s3302_s13 = inlined_call_operand.vmem [shape: f32[2,1,32], index: 13, kind: input, shape index: {}]   ;;  %s3303_s14 = inlined_call_operand.vmem [shape: f32[32,96], index: 14, kind: input, shape index: {}]   ;;  %s3304_s15 = inlined_call_operand.vmem [shape: f32[1,96], index: 15, kind: input, shape index: {}]   ;;  %s3305_s16 = inlined_call_operand.vmem [shape: f32[32,32], index: 16, kind: input, shape index: {}]   ;;  %s3306_s17 = inlined_call_operand.vmem [shape: f32[1,32], index: 17, kind: input, shape index: {}]   ;;  %s3307_s18 = inlined_call_operand.vmem [shape: f32[16,136], index: 18, kind: input, shape index: {}]   ;;  %s3308_s19 = inlined_call_operand.vmem [shape: f32[1,136], index: 19, kind: input, shape index: {}]   ;;  %s3309_s20 = inlined_call_operand.hbm [shape: f32[2,8,8], index: 20, kind: output, shape index: {0}]   ;;  %s3310_s21 = inlined_call_operand.vmem [shape: f32[2,8,8,8], index: 21, kind: output, shape index: {1}]  }
   0x1   :  { %3337 = sst [smem:[#allocation12_spill]] %s3289_s0 }
   0x2   :  { %3338 = sst [smem:[#allocation13_spill]] %s3290_s1 }
   0x3   :  { %3339 = sst [smem:[#allocation14_spill]] %s3291_s2 }
   0x4   :  { %3340 = sst [smem:[#allocation15_spill]] %s3292_s3 }
   0x5   :  { %3341 = sst [smem:[#allocation16_spill]] %s3293_s4 }
   0x6   :  { %3342 = sst [smem:[#allocation17_spill]] %s3294_s5 }
   0x7   :  { %3343 = sst [smem:[#allocation18_spill]] %s3295_s6 }
   0x8   :  { %3344 = sst [smem:[#allocation19_spill]] %s3296_s7 }
   0x9   :  { %3345 = sst [smem:[#allocation20_spill]] %s3297_s8 }
   0xa   :  { %3346 = sst [smem:[#allocation21_spill]] %s3309_s20 }
   0xb   :  { %3347 = sst [smem:[#allocation22_spill]] %s3310_s21 }
   0xc   :  { %27 = vsyncpa [#allocation3], 0 }
   0xd   :  { %29 = vsyncpa [#allocation3 + $0x1], 0  ;;  %s2724_s2 = smov 0   ;;  %s2726_s25 = smov 0  }
   0xe   :  { %s2728_s26 = smov 0   ;;  %s2730_s27 = smov 0  }
   0xf LB: > { %3348 = sst [smem:[#allocation5_spill]] %s2574_s2  ;;  %s2745_s3 = sadd.s32 4294967295, %s2586_s27   ;;  %s2586_s27 = sphi %s2730_s27, %s3389_s27   ;;  %s2582_s26 = sphi %s2728_s26, %s3394_s26   ;;  %s2578_s25 = sphi %s2726_s25, %s3393_s25   ;;  %s2574_s2 = sphi %s2724_s2, %s3392_s2  }
  0x10   : > { %3349 = sst [smem:[#allocation6_spill]] %s2582_s26  ;;  %s2279_s28 = sadd.s32 4294967294, %s2586_s27  }
  0x11   : > { %3350 = sst [smem:[#allocation7_spill]] %s2586_s27  ;;  %s2749_s29 = sadd.s32 1, %s2586_s27  }
  0x12   : > { %3351 = sst [smem:[#allocation8_spill]] %s2749_s29  ;;  %s472_s0 = sadd.s32 1, %s2582_s26 }
  0x13   : > { %s469_s4 = ssub.s32 %s2586_s27, %s2749_s29  ;;  %p482_p0 = scmp.ne.s32.totalorder %s2582_s26, %s2578_s25 }
  0x14   : > { %p470_p1 = scmp.eq.s32.totalorder %s469_s4, 0  ;;  %p483_p2 = scmp.eq.s32.totalorder %s2745_s3, 1 }
  0x15   : > { %p488_p3 = scmp.ne.s32.totalorder %s2578_s25, %s2574_s2  ;;  %p489_p4 = scmp.eq.s32.totalorder %s2279_s28, 1 }
  0x16   : > { %s2760_s30 = scalar_select %p470_p1, %s2582_s26, %s472_s0  }
  0x17   : > { %p2762_p5 = por %p483_p2, %p482_p0  ;;  %p2766_p6 = por %p489_p4, %p488_p3 }
  0x18   : > { %3352 = sst [smem:[#allocation9_spill]] %s2760_s30  ;;  %p2282_p7 = scmp.ge.s32.totalorder %s2586_s27, 1 }
  0x19   : > { %s3353_s5 = scalar_select %p2762_p5, 1, 0 }
  0x1a   : > { %s3355_s22 = scalar_select %p2766_p6, 1, 0 }
  0x1b   : > { %3354 = sst [smem:[#allocation10_spill]] %s3353_s5  ;;  %p600_p8 = scmp.lt.s32.totalorder %s2586_s27, 3 }
  0x1c   : > { %3356 = sst [smem:[#allocation11_spill]] %s3355_s22 }
  0x1d   : > { %p601_p9 = pnand %p2282_p7, %p600_p8 }
  0x1e   : > { %s3357_s24 = sld [smem:[#allocation14_spill]] (!%p601_p9)  ;;  %p667_p10 = scmp.lt.s32.totalorder (!%p601_p9), %s2745_s3, 1 }
  0x1f   : > { %604 = sbr.rel (%p601_p9) target bundleno = 4593 (0x11f1), region = 100  ;;  %s3358_s28 = sld [smem:[#allocation12_spill]] (!%p601_p9) }
  0x20   : > { %s3359_s27 = sld [smem:[#allocation15_spill]] (!%p601_p9)  ;;  %s3324_s29 = smov (!%p601_p9), 96  }
  0x21   : > { %s3326_s2 = smov (!%p601_p9), 104   ;;  %s3327_s22 = smov (!%p601_p9), 120  }
  0x22   : > { %s3322_s30 = smov (!%p601_p9), 64   ;;  %s3330_s4 = smov (!%p601_p9), 16  }
  0x23   : > { %s3331_s1 = smov (!%p601_p9), 24   ;;  %s3366_s8 = sld [smem:[#allocation20_spill]] (!%p601_p9) }
  0x24   : > { %v684_v0 = vld [vmem:[%s3357_s24 + $0x18] sm:$0xff]  ;;  %v683_v1 = vld [vmem:[%s3357_s24 + $0x10] sm:$0xff]  ;;  %v682_v2 = vld [vmem:[%s3357_s24 + $0x8] sm:$0xff]  ;;  %s2783_s26 = scalar_select %p667_p10, %s2745_s3, 1  ;;  %vm689_vm0 = vcmask 261120   ;;  %vm722_vm1 = vcmask 64512  }
  0x25   : > { %705 = vmatpush.msra.mxu0 %v684_v0  ;;  %v681_v3 = vld [vmem:[%s3357_s24] sm:$0xff]  ;;  %v2592_v16 = vmov 0   ;;  %s3367_s6 = sld [smem:[#allocation18_spill]]  ;;  %s3369_s21 = smov 112  }
  0x26   : > { %s2284_s23 = sshll.u32 %s2783_s26, 3  ;;  %s3360_s20 = smov %s3359_s27  ;;  %v2464_v5 = vld [vmem:[%s3359_s27] ss:$0 sm:$0xff] }
  0x27   : > { %706 = vmatpush.msra.mxu0 %v683_v1  ;;  %s670_s0 = scalar_lea.vmem %s3358_s28, %s2284_s23  ;;  %s3328_s23 = smov 112  }
  0x28   : > { %v2792_v4 = vld [vmem:[%s670_s0] sm:$0xff]  ;;  %s3361_s28 = sld [smem:[#allocation13_spill]]  ;;  %s3329_s27 = smov 8  }
  0x29   : > { %707 = vmatpush.msra.mxu0 %v682_v2  ;;  %s3368_s7 = sld [smem:[#allocation19_spill]]  ;;  %s3370_s5 = smov 120  }
  0x2b   : > { %708 = vmatpush.msra.mxu0 %v681_v3 }
  0x2c   : > { %2287 = vmatmul.msk.f32.vlgmr.msra.gmra.mxu0 %vm689_vm0, %v2792_v4 }
  0x2e   : > { %s673_s0 = scalar_lea.vmem %s3361_s28, %s2783_s26  ;;  %s3380_s28 = smov 24  }
  0x2f   : > { %v680_v15 = vld [vmem:[%s673_s0] sm:$0x1]  ;;  %s3336_s0 = sand.u32 1, %s2578_s25  }
  0x30   : > { %vm829_vm2 = vcmp.gt.f32.partialorder %v680_v15, 0.0 }
  0x31   : > { %v830_v17 = vsel %vm829_vm2, 1, %v2592_v16 }
  0x32   : > { %v831_v18 = vperm.slane %v830_v17, 0 }
  0x34   : > { %vm2837_vm3 = vcmp.eq.s32.totalorder %v831_v18, 1 }
  0xa9   : > { %v710_v6 = vpop.f32.mrf.mxu0 }
  0xaa   : > { %v2799_v7 = vadd.f32 %v2464_v5, %v710_v6 }
  0xac   : > { %720 = vrot.lane.b32.xlu2 %v2799_v7, %s3324_s29  ;;  %718 = vrot.lane.b32.xlu1 %v2799_v7, %s3326_s2  ;;  %s3372_s2 = smov 96  }
  0xad   : > { %714 = vrot.lane.b32.xlu0 %v2799_v7, %s3327_s22  ;;  %s3365_s22 = sld [smem:[#allocation17_spill]] }
  0xb5   : > { %716 = vrot.lane.b32.xlu0 %v2799_v7, %s3328_s23  ;;  %s3373_s23 = smov 64  }
 0x106   : > { %v721_v8 = vpop.permute.xlu2 %720 }
 0x107   : > { %2288 = vmatpush.xpose.msk.msra.mxu1 %vm722_vm1, %v721_v8 }
 0x10a   : > { %2289 = vmatmul.msk.f32.vlgmr.msra.gmra.mxu1 %vm722_vm1, %v2799_v7 }
 0x11e   : > { %v2812_v9 = vpop.permute.xlu1 %718 }
 0x11f   : > { %v2814_v10 = vpop.permute.xlu0 %714  ;;  %799 = vrot.lane.b32.xlu0 %v2812_v9, %s3324_s29 }
 0x120   : > { %747 = vrot.lane.b32.xlu1 %v2814_v10, %s3324_s29 }
 0x127   : > { %v2820_v11 = vpop.permute.xlu0 %716 }
 0x128   : > { %773 = vrot.lane.b32.xlu2 %v2820_v11, %s3324_s29  ;;  %v2446_v56 = vpack.i.bf16 %v2812_v9, %v2820_v11  ;;  %s3371_s29 = smov 104  }
 0x182   : > { %v774_v12 = vpop.permute.xlu2 %773 }
 0x183   : > { %2292 = vmatpush.xpose.msk.msra.mxu3 %vm722_vm1, %v774_v12 }
 0x186   : > { %2293 = vmatmul.msk.f32.vlgmr.msra.gmra.mxu3 %vm722_vm1, %v2820_v11 }
 0x187   : > { %v744_v20 = vpop.f32.mrf.mxu1 }
 0x188   : > { %v825_v25 = vmul.f32 0.35355338, %v744_v20 }
 0x18a   : > { %v833_v27 = vsel %vm2837_vm3, %v825_v25, -1e+10 }
 0x18b   : > { %v837_v29 = vsel %vm722_vm1, %v833_v27, -inf }
 0x191   : > { %v800_v13 = vpop.permute.xlu0 %799 }
 0x192   : > { %v748_v14 = vpop.permute.xlu1 %747  ;;  %2294 = vmatpush.xpose.msk.msrb.mxu1 %vm722_vm1, %v800_v13 }
 0x193   : > { %2290 = vmatpush.xpose.msk.msra.mxu2 %vm722_vm1, %v748_v14 }
 0x195   : > { %2295 = vmatmul.msk.f32.vlgmr.msrb.gmra.mxu1 %vm722_vm1, %v2812_v9 }
 0x196   : > { %2291 = vmatmul.msk.f32.vlgmr.msra.gmra.mxu2 %vm722_vm1, %v2814_v10 }
 0x209   : > { %v796_v19 = vpop.f32.mrf.mxu3 }
 0x20a   : > { %v827_v21 = vmul.f32 0.35355338, %v796_v19 }
 0x20c   : > { %v835_v23 = vsel %vm2837_vm3, %v827_v21, -1e+10 }
 0x20d   : > { %v843_v24 = vsel %vm722_vm1, %v835_v23, -inf }
 0x20e   : > { %844 = vmax.xlane.f32.xlu2 %v843_v24 }
 0x212   : > { %v822_v26 = vpop.f32.mrf.mxu1 }
 0x213   : > { %v828_v28 = vmul.f32 0.35355338, %v822_v26 }
 0x215   : > { %v836_v30 = vsel %vm2837_vm3, %v828_v28, -1e+10 }
 0x216   : > { %838 = vmax.xlane.f32.xlu2 %v837_v29  ;;  %v846_v31 = vsel %vm722_vm1, %v836_v30, -inf }
 0x217   : > { %847 = vmax.xlane.f32.xlu0 %v846_v31 }
 0x219   : > { %v770_v32 = vpop.f32.mrf.mxu2 }
 0x21a   : > { %v826_v33 = vmul.f32 0.35355338, %v770_v32 }
 0x21c   : > { %v834_v34 = vsel %vm2837_vm3, %v826_v33, -1e+10 }
 0x21d   : > { %v840_v35 = vsel %vm722_vm1, %v834_v34, -inf }
 0x21e   : > { %841 = vmax.xlane.f32.xlu1 %v840_v35 }
 0x281   : > { %v845_v36 = vpop.xlane.xlu2 %844 }
 0x282   : > { %v851_v37 = vsub.f32 %v835_v23, %v845_v36 }
 0x284   : > { %v857_v38 = vmul.f32 1.442695, %v851_v37 }
 0x286   : > { %2482 = vpow2.f32 %v857_v38 }
 0x289   : > { %v839_v39 = vpop.xlane.xlu2 %838 }
 0x28a   : > { %v848_v40 = vpop.xlane.xlu0 %847  ;;  %v849_v43 = vsub.f32 %v833_v27, %v839_v39 }
 0x28b   : > { %v852_v41 = vsub.f32 %v836_v30, %v848_v40 }
 0x28c   : > { %v2483_v42 = vpop.eup %2482  ;;  %v853_v46 = vmul.f32 1.442695, %v849_v43 }
 0x28d   : > { %v859_v44 = vmul.f32 1.442695, %v852_v41  ;;  %v867_v45 = vsel %vm722_vm1, %v2483_v42, 0.0 }
 0x28e   : > { %868 = vadd.xlane.f32.xlu2 %v867_v45 }
 0x28f   : > { %2484 = vpow2.f32 %v859_v44 }
 0x290   : > { %2486 = vpow2.f32 %v853_v46 }
 0x291   : > { %v842_v47 = vpop.xlane.xlu1 %841 }
 0x292   : > { %v850_v48 = vsub.f32 %v834_v34, %v842_v47 }
 0x294   : > { %v855_v49 = vmul.f32 1.442695, %v850_v48 }
 0x295   : > { %v2854_v50 = vpop.eup %2484 }
 0x296   : > { %2488 = vpow2.f32 %v855_v49  ;;  %v870_v51 = vsel %vm722_vm1, %v2854_v50, 0.0  ;;  %v2858_v52 = vpop.eup %2486 }
 0x297   : > { %871 = vadd.xlane.f32.xlu0 %v870_v51  ;;  %v861_v55 = vsel %vm722_vm1, %v2858_v52, 0.0 }
 0x29c   : > { %v2860_v53 = vpop.eup %2488 }
 0x29d   : > { %v864_v54 = vsel %vm722_vm1, %v2860_v53, 0.0 }
 0x29e   : > { %865 = vadd.xlane.f32.xlu1 %v864_v54 }
 0x29f   : > { %862 = vadd.xlane.f32.xlu0 %v861_v55 }
 0x2a6   : > { %2447 = vrot.lane.b32.xlu2 %v2446_v56, %s3322_s30 }
 0x2b3   : > { %933 = vrot.lane.b32.xlu0 %v2799_v7, %s3322_s30 }
 0x2b7   : > { %959 = vrot.lane.b32.xlu1 %v2814_v10, %s3322_s30  ;;  %s3364_s30 = sld [smem:[#allocation16_spill]] }
 0x2bd   : > { %v1057_v51 = vld [vmem:[%s3364_s30 + $0x18] sm:$0xff]  ;;  %v1054_v54 = vld [vmem:[%s3364_s30] sm:$0xff] }
 0x301   : > { %v869_v57 = vpop.xlane.xlu2 %868 }
 0x302   : > { %2490 = vrcp.f32 %v869_v57  ;;  %v914_v2 = vand.u32 2147483648, %v869_v57  ;;  %vm908_vm5 = vweird.f32 %v869_v57  ;;  %v912_v5 = vand.u32 2147483647, %v869_v57 }
 0x304   : > { %v915_v9 = vor.u32 1.1754944e-38, %v914_v2  ;;  %vm913_vm7 = vcmp.eq.f32.partialorder %v912_v5, 8.507059e+37 }
 0x308   : > { %v2491_v58 = vpop.eup %2490 }
 0x309   : > { %v904_v59 = vmul.f32 %v2491_v58, %v869_v57  ;;  %v2448_v60 = vpop.permute.xlu2 %2447  ;;  %vm909_vm4 = vweird.f32 %v2491_v58 }
 0x30a   : > { %v2450_v61 = vunpack.i.h.bf16 %v2448_v60  ;;  %v872_v62 = vpop.xlane.xlu0 %871  ;;  %v2449_v63 = vunpack.i.l.bf16 %v2448_v60  ;;  %vm910_vm6 = vmor %vm908_vm5, %vm909_vm4 }
 0x30b   : > { %v905_v0 = vsub.f32 1.0, %v904_v59  ;;  %2492 = vrcp.f32 %v872_v62  ;;  %v929_v14 = vand.u32 2147483648, %v872_v62  ;;  %v927_v17 = vand.u32 2147483647, %v872_v62 }
 0x30c   : > { %1006 = vmatpush.msrb.mxu0 %v2449_v63  ;;  %1032 = vmatpush.msra.mxu1 %v2450_v61  ;;  %vm923_vm9 = vweird.f32 %v872_v62 }
 0x30d   : > { %v906_v1 = vmul.f32 %v2491_v58, %v905_v0  ;;  %v930_v21 = vor.u32 1.1754944e-38, %v929_v14  ;;  %vm928_vm11 = vcmp.eq.f32.partialorder %v927_v17, 8.507059e+37  ;;  %v1126_v17 = vld [vmem:[%s3366_s8 + $0x8] sm:$0xff] }
 0x30f   : > { %v907_v3 = vadd.f32 %v2491_v58, %v906_v1 }
 0x311   : > { %v2493_v6 = vpop.eup %2492  ;;  %v866_v7 = vpop.xlane.xlu1 %865  ;;  %v911_v8 = vsel %vm910_vm6, %v2491_v58, %v907_v3  ;;  %v2597_v3 = vmov 32.0  }
 0x312   : > { %v919_v10 = vmul.f32 %v2493_v6, %v872_v62  ;;  %2494 = vrcp.f32 %v866_v7  ;;  %v863_v11 = vpop.xlane.xlu0 %862  ;;  %v916_v13 = vsel %vm913_vm7, %v915_v9, %v911_v8  ;;  %vm924_vm8 = vweird.f32 %v2493_v6  ;;  %v2465_v62 = vld [vmem:[%s3365_s22] ss:$0 sm:$0xff] }
 0x313   : > { %2496 = vrcp.f32 %v863_v11  ;;  %v917_v15 = vmul.f32 %v2483_v42, %v916_v13  ;;  %vm925_vm10 = vmor %vm923_vm9, %vm924_vm8  ;;  %v884_v31 = vand.u32 2147483648, %v863_v11  ;;  %v882_v33 = vand.u32 2147483647, %v863_v11 }
 0x314   : > { %v920_v12 = vsub.f32 1.0, %v919_v10  ;;  %v899_v35 = vand.u32 2147483648, %v866_v7  ;;  %vm878_vm14 = vweird.f32 %v863_v11  ;;  %vm893_vm15 = vweird.f32 %v866_v7 }
 0x315   : > { %2298 = vmatmul.msk.f32.vlgmr.msrb.gmra.mxu0 %vm722_vm1, %v917_v15  ;;  %v897_v37 = vand.u32 2147483647, %v866_v7  ;;  %v885_v38 = vor.u32 1.1754944e-38, %v884_v31  ;;  %vm883_vm5 = vcmp.eq.f32.partialorder %v882_v33, 8.507059e+37  ;;  %vm1050_vm7 = vcmask 130048   ;;  %v1128_v15 = vld [vmem:[%s3366_s8 + $0x18] sm:$0xff] }
 0x316   : > { %v921_v16 = vmul.f32 %v2493_v6, %v920_v12  ;;  %v900_v42 = vor.u32 1.1754944e-38, %v899_v35  ;;  %vm1052_vm8 = vcmask 195584   ;;  %2498 = vrcp.f32 %v2597_v3 }
 0x317   : > { %vm898_vm6 = vcmp.eq.f32.partialorder %v897_v37, 8.507059e+37  ;;  %v2467_v37 = vld [vmem:[%s3368_s7] ss:$0 sm:$0xff] }
 0x318   : > { %v2495_v18 = vpop.eup %2494  ;;  %v922_v19 = vadd.f32 %v2493_v6, %v921_v16  ;;  %v1127_v16 = vld [vmem:[%s3366_s8 + $0x10] sm:$0xff] }
 0x319   : > { %v2497_v20 = vpop.eup %2496  ;;  %v889_v23 = vmul.f32 %v2495_v18, %v866_v7  ;;  %vm894_vm13 = vweird.f32 %v2495_v18 }
 0x31a   : > { %v926_v24 = vsel %vm925_vm10, %v2493_v6, %v922_v19  ;;  %v874_v25 = vmul.f32 %v2497_v20, %v863_v11  ;;  %vm879_vm12 = vweird.f32 %v2497_v20  ;;  %vm895_vm4 = vmor %vm893_vm15, %vm894_vm13  ;;  %v1164_v19 = vld [vmem:[%s3299_s10 + $0x38] sm:$0xff]  ;;  %vm1169_vm13 = vcmask 523264  }
 0x31b   : > { %v931_v26 = vsel %vm928_vm11, %v930_v21, %v926_v24  ;;  %v890_v27 = vsub.f32 1.0, %v889_v23  ;;  %vm880_vm2 = vmor %vm878_vm14, %vm879_vm12  ;;  %1181 = vmatpush.msra.mxu0 %v1164_v19  ;;  %v1162_v21 = vld [vmem:[%s3299_s10 + $0x28] sm:$0xff] }
 0x31c   : > { %v875_v28 = vsub.f32 1.0, %v874_v25  ;;  %v932_v29 = vmul.f32 %v2854_v50, %v931_v26  ;;  %v2499_v5 = vpop.eup %2498  ;;  %v1161_v25 = vld [vmem:[%s3299_s10 + $0x20] sm:$0xff] }
 0x31d   : > { %v891_v30 = vmul.f32 %v2495_v18, %v890_v27  ;;  %v1092_v6 = vmul.f32 32.0, %v2499_v5  ;;  %vm1096_vm9 = vweird.f32 %v2499_v5  ;;  %v1160_v27 = vld [vmem:[%s3299_s10 + $0x18] sm:$0xff] }
 0x31e   : > { %v876_v32 = vmul.f32 %v2497_v20, %v875_v28  ;;  %2299 = vmatmul.msk.f32.vlgmr.msra.gmra.mxu1 %vm722_vm1, %v932_v29 }
 0x31f   : > { %v892_v34 = vadd.f32 %v2495_v18, %v891_v30  ;;  %v1093_v7 = vsub.f32 1.0, %v1092_v6 }
 0x320   : > { %v877_v36 = vadd.f32 %v2497_v20, %v876_v32 }
 0x321   : > { %v896_v41 = vsel %vm895_vm4, %v2495_v18, %v892_v34  ;;  %v1094_v8 = vmul.f32 %v2499_v5, %v1093_v7  ;;  %v1125_v18 = vld [vmem:[%s3366_s8] sm:$0xff] }
 0x322   : > { %v881_v39 = vsel %vm880_vm2, %v2497_v20, %v877_v36  ;;  %v901_v45 = vsel %vm898_vm6, %v900_v42, %v896_v41  ;;  %v1163_v20 = vld [vmem:[%s3299_s10 + $0x30] sm:$0xff]  ;;  %v2466_v34 = vld [vmem:[%s3367_s6] ss:$0 sm:$0xff]  ;;  %v1158_v41 = vld [vmem:[%s3299_s10 + $0x8] sm:$0xff] }
 0x323   : > { %v886_v40 = vsel %vm883_vm5, %v885_v38, %v881_v39  ;;  %v902_v47 = vmul.f32 %v2860_v53, %v901_v45  ;;  %v1055_v53 = vld [vmem:[%s3364_s30 + $0x8] sm:$0xff]  ;;  %v1095_v9 = vadd.f32 %v2499_v5, %v1094_v8  ;;  %1182 = vmatpush.msra.mxu0 %v1163_v20  ;;  %v1157_v42 = vld [vmem:[%s3299_s10] sm:$0xff] }
 0x324   : > { %v887_v43 = vmul.f32 %v2858_v52, %v886_v40  ;;  %v1056_v52 = vld [vmem:[%s3364_s30 + $0x10] sm:$0xff]  ;;  %v2470_v7 = vld [vmem:[%s3301_s12] ss:$0 sm:$0xff] }
 0x325   : > { %v934_v44 = vpop.permute.xlu0 %933  ;;  %v2904_v10 = vsel %vm1096_vm9, %v2499_v5, %v1095_v9  ;;  %1183 = vmatpush.msra.mxu0 %v1162_v21  ;;  %v1159_v40 = vld [vmem:[%s3299_s10 + $0x10] sm:$0xff] }
 0x326   : > { %954 = vmatpush.msrb.mxu2 %v934_v44 }
 0x327   : > { %2296 = vmatmul.msk.f32.vlgmr.msrb.gmra.mxu2 %vm722_vm1, %v887_v43  ;;  %1184 = vmatpush.msra.mxu0 %v1161_v25  ;;  %v2468_v43 = vld [vmem:[%s3298_s9] ss:$0 sm:$0xff] }
 0x328   : > { %1077 = vmatpush.msra.mxu2 %v1057_v51 }
 0x329   : > { %v960_v46 = vpop.permute.xlu1 %959  ;;  %1185 = vmatpush.msra.mxu0 %v1160_v27 }
 0x32a   : > { %980 = vmatpush.msrb.mxu3 %v960_v46  ;;  %1078 = vmatpush.msra.mxu2 %v1056_v52 }
 0x32b   : > { %2297 = vmatmul.msk.f32.vlgmr.msrb.gmra.mxu3 %vm722_vm1, %v902_v47  ;;  %1186 = vmatpush.msra.mxu0 %v1159_v40  ;;  %v2469_v47 = vld [vmem:[%s3300_s11] ss:$0 sm:$0xff] }
 0x32c   : > { %1079 = vmatpush.msra.mxu2 %v1055_v53  ;;  %1148 = vmatpush.msra.mxu3 %v1128_v15 }
 0x32d   : > { %1187 = vmatpush.msra.mxu0 %v1158_v41 }
 0x32e   : > { %1080 = vmatpush.msra.mxu2 %v1054_v54  ;;  %1149 = vmatpush.msra.mxu3 %v1127_v16 }
 0x32f   : > { %1188 = vmatpush.msra.mxu0 %v1157_v42 }
 0x330   : > { %1150 = vmatpush.msra.mxu3 %v1126_v17 }
 0x332   : > { %1151 = vmatpush.msra.mxu3 %v1125_v18 }
 0x392   : > { %v1008_v48 = vpop.f32.mrf.mxu0 }
 0x393   : > { %1042 = vrot.lane.b32.xlu2 %v1008_v48, %s3330_s4  ;;  %s3378_s4 = smov 16  }
 0x39b   : > { %v1034_v50 = vpop.f32.mrf.mxu1 }
 0x3aa   : > { %v956_v56 = vpop.f32.mrf.mxu2 }
 0x3ae   : > { %v982_v49 = vpop.f32.mrf.mxu3 }
 0x3af   : > { %1038 = vrot.lane.b32.xlu1 %v982_v49, %s3329_s27  ;;  %s3379_s27 = smov 8  }
 0x3b7   : > { %1046 = vrot.lane.b32.xlu1 %v1034_v50, %s3331_s1  ;;  %s2607_s1 = smov 43  }
 0x3ed   : > { %v1043_v58 = vpop.permute.xlu2 %1042 }
 0x421   : > { %v1039_v55 = vpop.permute.xlu1 %1038 }
 0x422   : > { %v1049_v57 = vsel %vm722_vm1, %v956_v56, %v1039_v55 }
 0x423   : > { %v1051_v60 = vsel %vm1050_vm7, %v1049_v57, %v1043_v58  ;;  %v2306_v57 = vld [vmem:[%s3357_s24 + $0x38] sm:$0xff]  ;;  %v2305_v58 = vld [vmem:[%s3357_s24 + $0x30] sm:$0xff] }
 0x424   : > { %1251 = vmatpush.msrb.mxu1 %v2306_v57 }
 0x426   : > { %1252 = vmatpush.msrb.mxu1 %v2305_v58 }
 0x429   : > { %v1047_v59 = vpop.permute.xlu1 %1046 }
 0x42a   : > { %v1053_v61 = vsel %vm1052_vm8, %v1051_v60, %v1047_v59  ;;  %v2304_v59 = vld [vmem:[%s3357_s24 + $0x28] sm:$0xff]  ;;  %v2303_v60 = vld [vmem:[%s3357_s24 + $0x20] sm:$0xff] }
 0x42b   : > { %2300 = vmatmul.msk.f32.vlgmr.msra.gmra.mxu2 %vm689_vm0, %v1053_v61  ;;  %1253 = vmatpush.msrb.mxu1 %v2304_v59 }
 0x42d   : > { %1254 = vmatpush.msrb.mxu1 %v2303_v60 }
 0x4ae   : > { %v1082_v63 = vpop.f32.mrf.mxu2 }
 0x4af   : > { %v1083_v0 = vadd.f32 %v2465_v62, %v1082_v63 }
 0x4b1   : > { %v1085_v1 = vadd.f32 %v1083_v0, %v2792_v4 }
 0x4b3   : > { %v1088_v2 = vsel %vm689_vm0, %v1085_v1, 0.0 }
 0x4b4   : > { %1089 = vadd.xlane.f32.xlu0 %v1088_v2 }
 0x527   : > { %v1090_v11 = vpop.xlane.xlu0 %1089 }
 0x528   : > { %v1098_v12 = vmul.f32 %v2904_v10, %v1090_v11  ;;  %v2471_v11 = vld [vmem:[%s3302_s13] ss:$0 sm:$0xff] }
 0x52a   : > { %v1099_v13 = vsub.f32 %v1085_v1, %v1098_v12 }
 0x52c   : > { %v1100_v14 = vmul.f32 %v1099_v13, %v1099_v13 }
 0x52e   : > { %v1101_v4 = vsel %vm689_vm0, %v1100_v14, 0.0  ;;  %v2472_v14 = vld [vmem:[%s3360_s20 + $0x1] ss:$0 sm:$0xff]  ;;  %s2605_s20 = smov 26  }
 0x52f   : > { %1102 = vadd.xlane.f32.xlu2 %v1101_v4 }
 0x5a2   : > { %v1103_v23 = vpop.xlane.xlu2 %1102 }
 0x5a3   : > { %v1104_v24 = vmul.f32 %v1103_v23, %v2904_v10 }
 0x5a5   : > { %v1105_v26 = vadd.f32 1e-05, %v1104_v24 }
 0x5a7   : > { %2500 = vrsqrt.f32 %v1105_v26  ;;  %vm1112_vm11 = vweird.f32 %v1105_v26 }
 0x5ad   : > { %v2501_v28 = vpop.eup %2500 }
 0x5ae   : > { %v1107_v29 = vmul.f32 %v2501_v28, %v1105_v26  ;;  %vm1113_vm10 = vweird.f32 %v2501_v28 }
 0x5af   : > { %vm1114_vm12 = vmor %vm1112_vm11, %vm1113_vm10 }
 0x5b0   : > { %v1108_v30 = vmul.f32 %v2501_v28, %v1107_v29 }
 0x5b2   : > { %v1109_v31 = vmul.f32 0.5, %v1108_v30 }
 0x5b4   : > { %v1110_v32 = vsub.f32 1.5, %v1109_v31 }
 0x5b6   : > { %v1111_v33 = vmul.f32 %v2501_v28, %v1110_v32 }
 0x5b8   : > { %v1115_v35 = vsel %vm1114_vm12, %v2501_v28, %v1111_v33 }
 0x5b9   : > { %v1116_v36 = vmul.f32 %v1115_v35, %v1099_v13 }
 0x5bb   : > { %v1120_v38 = vmul.f32 %v2466_v34, %v1116_v36 }
 0x5bd   : > { %v1124_v39 = vadd.f32 %v2467_v37, %v1120_v38 }
 0x5bf   : > { %2301 = vmatmul.msk.f32.vlgmr.msra.gmra.mxu3 %vm689_vm0, %v1124_v39 }
 0x642   : > { %v1153_v44 = vpop.f32.mrf.mxu3 }
 0x643   : > { %v1154_v45 = vadd.f32 %v2468_v43, %v1153_v44 }
 0x645   : > { %v1156_v46 = vmax.f32 %v1154_v45, 0.0 }
 0x647   : > { %2302 = vmatmul.msk.f32.vlgmr.msra.gmra.mxu0 %vm1169_vm13, %v1156_v46 }
 0x6c4   : > { %v1190_v48 = vpop.f32.mrf.mxu0 }
 0x6c5   : > { %v1191_v49 = vadd.f32 %v2469_v47, %v1190_v48 }
 0x6c7   : > { %v1193_v50 = vadd.f32 %v1191_v49, %v1124_v39 }
 0x6c9   : > { %v1196_v51 = vsel %vm689_vm0, %v1193_v50, 0.0 }
 0x6ca   : > { %1197 = vadd.xlane.f32.xlu1 %v1196_v51 }
 0x73d   : > { %v1198_v52 = vpop.xlane.xlu1 %1197 }
 0x73e   : > { %v1199_v53 = vmul.f32 %v1198_v52, %v2904_v10 }
 0x740   : > { %v1200_v54 = vsub.f32 %v1193_v50, %v1199_v53 }
 0x742   : > { %v1201_v55 = vmul.f32 %v1200_v54, %v1200_v54 }
 0x744   : > { %v1202_v56 = vsel %vm689_vm0, %v1201_v55, 0.0 }
 0x745   : > { %1203 = vadd.xlane.f32.xlu0 %v1202_v56 }
 0x7b8   : > { %v1204_v61 = vpop.xlane.xlu0 %1203 }
 0x7b9   : > { %v1205_v62 = vmul.f32 %v1204_v61, %v2904_v10 }
 0x7bb   : > { %v1206_v63 = vadd.f32 1e-05, %v1205_v62 }
 0x7bd   : > { %2502 = vrsqrt.f32 %v1206_v63  ;;  %vm1213_vm15 = vweird.f32 %v1206_v63 }
 0x7c3   : > { %v2503_v0 = vpop.eup %2502 }
 0x7c4   : > { %v1208_v1 = vmul.f32 %v2503_v0, %v1206_v63  ;;  %vm1214_vm14 = vweird.f32 %v2503_v0 }
 0x7c5   : > { %vm1215_vm2 = vmor %vm1213_vm15, %vm1214_vm14 }
 0x7c6   : > { %v1209_v2 = vmul.f32 %v2503_v0, %v1208_v1 }
 0x7c8   : > { %v1210_v3 = vmul.f32 0.5, %v1209_v2 }
 0x7ca   : > { %v1211_v5 = vsub.f32 1.5, %v1210_v3 }
 0x7cc   : > { %v1212_v6 = vmul.f32 %v2503_v0, %v1211_v5 }
 0x7ce   : > { %v1216_v8 = vsel %vm1215_vm2, %v2503_v0, %v1212_v6 }
 0x7cf   : > { %v1217_v9 = vmul.f32 %v1216_v8, %v1200_v54 }
 0x7d1   : > { %v1221_v12 = vmul.f32 %v2470_v7, %v1217_v9 }
 0x7d3   : > { %v2981_v13 = vadd.f32 %v2471_v11, %v1221_v12 }
 0x7d5   : > { %2308 = vmatmul.msk.f32.vlgmr.msrb.gmra.mxu1 %vm689_vm0, %v2981_v13 }
 0x852   : > { %v1256_v4 = vpop.f32.mrf.mxu1 }
 0x853   : > { %v2988_v15 = vadd.f32 %v2472_v14, %v1256_v4 }
 0x855   : > { %1262 = vrot.lane.b32.xlu0 %v2988_v15, %s3369_s21  ;;  %1260 = vrot.lane.b32.xlu1 %v2988_v15, %s3370_s5  ;;  %s2380_s5 = sshll.u32 %s2783_s26, 6 }
 0x856   : > { %1264 = vrot.lane.b32.xlu2 %v2988_v15, %s3371_s29  ;;  %s2598_s29 = smov 48  }
 0x85e   : > { %1266 = vrot.lane.b32.xlu2 %v2988_v15, %s3372_s2 }
 0x8b0   : > { %v2998_v16 = vpop.permute.xlu2 %1264 }
 0x8b1   : > { %1344 = vrot.lane.b32.xlu0 %v2998_v16, %s3372_s2 }
 0x8b8   : > { %v1267_v17 = vpop.permute.xlu2 %1266 }
 0x8b9   : > { %2309 = vmatpush.xpose.msk.msrb.mxu2 %vm722_vm1, %v1267_v17 }
 0x8bc   : > { %2310 = vmatmul.msk.f32.vlgmr.msrb.gmra.mxu2 %vm722_vm1, %v2988_v15 }
 0x8c7   : > { %v3005_v18 = vpop.permute.xlu0 %1262  ;;  %v1261_v19 = vpop.permute.xlu1 %1260 }
 0x8c8   : > { %1292 = vrot.lane.b32.xlu1 %v1261_v19, %s3372_s2  ;;  %1318 = vrot.lane.b32.xlu2 %v3005_v18, %s3372_s2  ;;  %v2451_v60 = vpack.i.bf16 %v1261_v19, %v2998_v16 }
 0x922   : > { %v1319_v20 = vpop.permute.xlu2 %1318 }
 0x923   : > { %v1345_v21 = vpop.permute.xlu0 %1344  ;;  %2313 = vmatpush.xpose.msk.msra.mxu1 %vm722_vm1, %v1319_v20 }
 0x924   : > { %2315 = vmatpush.xpose.msk.msra.mxu2 %vm722_vm1, %v1345_v21 }
 0x926   : > { %2314 = vmatmul.msk.f32.vlgmr.msra.gmra.mxu1 %vm722_vm1, %v3005_v18 }
 0x927   : > { %2316 = vmatmul.msk.f32.vlgmr.msra.gmra.mxu2 %vm722_vm1, %v2998_v16 }
 0x93a   : > { %v1293_v23 = vpop.permute.xlu1 %1292 }
 0x93b   : > { %2311 = vmatpush.xpose.msk.msrb.mxu3 %vm722_vm1, %v1293_v23 }
 0x93e   : > { %2312 = vmatmul.msk.f32.vlgmr.msrb.gmra.mxu3 %vm722_vm1, %v1261_v19 }
 0x93f   : > { %v1289_v24 = vpop.f32.mrf.mxu2 }
 0x940   : > { %v1370_v33 = vmul.f32 0.35355338, %v1289_v24 }
 0x942   : > { %v1374_v34 = vsel %vm2837_vm3, %v1370_v33, -1e+10 }
 0x943   : > { %v1378_v35 = vsel %vm722_vm1, %v1374_v34, -inf }
 0x9a3   : > { %v1341_v25 = vpop.f32.mrf.mxu1 }
 0x9a4   : > { %v1372_v26 = vmul.f32 0.35355338, %v1341_v25 }
 0x9a6   : > { %v1376_v27 = vsel %vm2837_vm3, %v1372_v26, -1e+10 }
 0x9a7   : > { %v1384_v28 = vsel %vm722_vm1, %v1376_v27, -inf }
 0x9a8   : > { %1385 = vmax.xlane.f32.xlu2 %v1384_v28 }
 0x9aa   : > { %v1367_v29 = vpop.f32.mrf.mxu2 }
 0x9ab   : > { %v1373_v30 = vmul.f32 0.35355338, %v1367_v29 }
 0x9ad   : > { %v1377_v31 = vsel %vm2837_vm3, %v1373_v30, -1e+10 }
 0x9ae   : > { %v1387_v32 = vsel %vm722_vm1, %v1377_v31, -inf }
 0x9af   : > { %1388 = vmax.xlane.f32.xlu0 %v1387_v32 }
 0x9b7   : > { %1379 = vmax.xlane.f32.xlu0 %v1378_v35 }
 0x9c1   : > { %v1315_v36 = vpop.f32.mrf.mxu3 }
 0x9c2   : > { %v1371_v37 = vmul.f32 0.35355338, %v1315_v36 }
 0x9c4   : > { %v1375_v38 = vsel %vm2837_vm3, %v1371_v37, -1e+10 }
 0x9c5   : > { %v1381_v39 = vsel %vm722_vm1, %v1375_v38, -inf }
 0x9c6   : > { %1382 = vmax.xlane.f32.xlu1 %v1381_v39 }
 0xa1b   : > { %v1386_v40 = vpop.xlane.xlu2 %1385 }
 0xa1c   : > { %v1392_v41 = vsub.f32 %v1376_v27, %v1386_v40 }
 0xa1e   : > { %v1398_v42 = vmul.f32 1.442695, %v1392_v41 }
 0xa20   : > { %2504 = vpow2.f32 %v1398_v42 }
 0xa22   : > { %v1389_v43 = vpop.xlane.xlu0 %1388 }
 0xa23   : > { %v1393_v44 = vsub.f32 %v1377_v31, %v1389_v43 }
 0xa25   : > { %v1400_v45 = vmul.f32 1.442695, %v1393_v44 }
 0xa26   : > { %v3030_v46 = vpop.eup %2504 }
 0xa27   : > { %2506 = vpow2.f32 %v1400_v45  ;;  %v1408_v47 = vsel %vm722_vm1, %v3030_v46, 0.0 }
 0xa28   : > { %1409 = vadd.xlane.f32.xlu0 %v1408_v47 }
 0xa2a   : > { %v1380_v48 = vpop.xlane.xlu0 %1379 }
 0xa2b   : > { %v1390_v49 = vsub.f32 %v1374_v34, %v1380_v48 }
 0xa2d   : > { %v3034_v50 = vpop.eup %2506  ;;  %v1394_v51 = vmul.f32 1.442695, %v1390_v49 }
 0xa2e   : > { %v1411_v52 = vsel %vm722_vm1, %v3034_v50, 0.0 }
 0xa2f   : > { %2508 = vpow2.f32 %v1394_v51  ;;  %1412 = vadd.xlane.f32.xlu1 %v1411_v52 }
 0xa35   : > { %v3038_v53 = vpop.eup %2508 }
 0xa36   : > { %v1402_v54 = vsel %vm722_vm1, %v3038_v53, 0.0 }
 0xa37   : > { %1403 = vadd.xlane.f32.xlu0 %v1402_v54 }
 0xa39   : > { %v1383_v55 = vpop.xlane.xlu1 %1382 }
 0xa3a   : > { %v1391_v56 = vsub.f32 %v1375_v38, %v1383_v55 }
 0xa3c   : > { %v1396_v57 = vmul.f32 1.442695, %v1391_v56 }
 0xa3e   : > { %2510 = vpow2.f32 %v1396_v57 }
 0xa44   : > { %v3042_v58 = vpop.eup %2510 }
 0xa45   : > { %v1405_v59 = vsel %vm722_vm1, %v3042_v58, 0.0 }
 0xa46   : > { %1406 = vadd.xlane.f32.xlu2 %v1405_v59  ;;  %v2324_v59 = vld [vmem:[%s3364_s30 + $0x38] sm:$0xff] }
 0xa48   : > { %2452 = vrot.lane.b32.xlu1 %v2451_v60, %s3373_s23  ;;  %v2323_v60 = vld [vmem:[%s3364_s30 + $0x30] sm:$0xff] }
 0xa4b   : > { %1474 = vrot.lane.b32.xlu0 %v2988_v15, %s3373_s23 }
 0xa5e   : > { %1526 = vrot.lane.b32.xlu2 %v3005_v18, %s3373_s23 }
 0xa9b   : > { %v1410_v61 = vpop.xlane.xlu0 %1409 }
 0xa9c   : > { %2512 = vrcp.f32 %v1410_v61  ;;  %v1455_v24 = vand.u32 2147483648, %v1410_v61  ;;  %vm1449_vm14 = vweird.f32 %v1410_v61  ;;  %v1453_v26 = vand.u32 2147483647, %v1410_v61 }
 0xa9e   : > { %v1456_v37 = vor.u32 1.1754944e-38, %v1455_v24 }
 0xaa2   : > { %v1413_v62 = vpop.xlane.xlu1 %1412  ;;  %v2513_v63 = vpop.eup %2512 }
 0xaa3   : > { %2514 = vrcp.f32 %v1413_v62  ;;  %v1445_v3 = vmul.f32 %v2513_v63, %v1410_v61  ;;  %v1470_v14 = vand.u32 2147483648, %v1413_v62  ;;  %vm1464_vm5 = vweird.f32 %v1413_v62  ;;  %v2321_v61 = vld [vmem:[%s3364_s30 + $0x20] sm:$0xff] }
 0xaa4   : > { %v1468_v4 = vand.u32 2147483647, %v1413_v62  ;;  %vm1450_vm10 = vweird.f32 %v2513_v63 }
 0xaa5   : > { %v1446_v7 = vsub.f32 1.0, %v1445_v3  ;;  %v1471_v23 = vor.u32 1.1754944e-38, %v1470_v14  ;;  %vm3058_vm2 = vmor %vm1449_vm14, %vm1450_vm10 }
 0xaa6   : > { %vm1469_vm11 = vcmp.eq.f32.partialorder %v1468_v4, 8.507059e+37 }
 0xaa7   : > { %v1447_v12 = vmul.f32 %v2513_v63, %v1446_v7 }
 0xaa9   : > { %v2515_v0 = vpop.eup %2514  ;;  %v1448_v21 = vadd.f32 %v2513_v63, %v1447_v12 }
 0xaaa   : > { %v1460_v1 = vmul.f32 %v2515_v0, %v1413_v62  ;;  %v1404_v2 = vpop.xlane.xlu0 %1403  ;;  %vm1465_vm4 = vweird.f32 %v2515_v0 }
 0xaab   : > { %2516 = vrcp.f32 %v1404_v2  ;;  %vm3052_vm6 = vmor %vm1464_vm5, %vm1465_vm4  ;;  %v1425_v17 = vand.u32 2147483648, %v1404_v2  ;;  %v1423_v20 = vand.u32 2147483647, %v1404_v2  ;;  %vm1419_vm12 = vweird.f32 %v1404_v2 }
 0xaac   : > { %v1461_v5 = vsub.f32 1.0, %v1460_v1  ;;  %v1452_v33 = vsel %vm3058_vm2, %v2513_v63, %v1448_v21  ;;  %vm1454_vm5 = vcmp.eq.f32.partialorder %v1453_v26, 8.507059e+37  ;;  %v2341_v21 = vld [vmem:[%s3299_s10 + $0x70] sm:$0xff]  ;;  %v2339_v26 = vld [vmem:[%s3299_s10 + $0x60] sm:$0xff] }
 0xaad   : > { %v1426_v28 = vor.u32 1.1754944e-38, %v1425_v17  ;;  %vm1424_vm4 = vcmp.eq.f32.partialorder %v1423_v20, 8.507059e+37  ;;  %v1457_v41 = vsel %vm1454_vm5, %v1456_v37, %v1452_v33  ;;  %v2332_v17 = vld [vmem:[%s3366_s8 + $0x38] sm:$0xff] }
 0xaae   : > { %v1462_v6 = vmul.f32 %v2515_v0, %v1461_v5  ;;  %v1458_v45 = vmul.f32 %v3030_v46, %v1457_v41  ;;  %v2342_v20 = vld [vmem:[%s3299_s10 + $0x78] sm:$0xff]  ;;  %v2337_v41 = vld [vmem:[%s3299_s10 + $0x50] sm:$0xff] }
 0xab0   : > { %v1463_v9 = vadd.f32 %v2515_v0, %v1462_v6  ;;  %v2473_v6 = vld [vmem:[%s3365_s22 + $0x1] ss:$0 sm:$0xff]  ;;  %s2603_s22 = smov 77  }
 0xab1   : > { %v2517_v8 = vpop.eup %2516 }
 0xab2   : > { %v1415_v11 = vmul.f32 %v2517_v8, %v1404_v2  ;;  %v1467_v18 = vsel %vm3052_vm6, %v2515_v0, %v1463_v9  ;;  %vm1420_vm9 = vweird.f32 %v2517_v8 }
 0xab3   : > { %v1472_v27 = vsel %vm1469_vm11, %v1471_v23, %v1467_v18  ;;  %vm1421_vm15 = vmor %vm1419_vm12, %vm1420_vm9  ;;  %v2330_v18 = vld [vmem:[%s3366_s8 + $0x28] sm:$0xff] }
 0xab4   : > { %v1416_v15 = vsub.f32 1.0, %v1415_v11  ;;  %v1473_v38 = vmul.f32 %v3034_v50, %v1472_v27  ;;  %v2340_v23 = vld [vmem:[%s3299_s10 + $0x68] sm:$0xff] }
 0xab6   : > { %v1417_v19 = vmul.f32 %v2517_v8, %v1416_v15 }
 0xab8   : > { %v1418_v25 = vadd.f32 %v2517_v8, %v1417_v19  ;;  %v2329_v19 = vld [vmem:[%s3366_s8 + $0x20] sm:$0xff] }
 0xab9   : > { %v1407_v29 = vpop.xlane.xlu2 %1406 }
 0xaba   : > { %v1422_v31 = vsel %vm1421_vm15, %v2517_v8, %v1418_v25  ;;  %v2453_v32 = vpop.permute.xlu1 %2452  ;;  %2518 = vrcp.f32 %v1407_v29  ;;  %v1440_v48 = vand.u32 2147483648, %v1407_v29  ;;  %v1438_v50 = vand.u32 2147483647, %v1407_v29 }
 0xabb   : > { %v1427_v34 = vsel %vm1424_vm4, %v1426_v28, %v1422_v31  ;;  %v2455_v35 = vunpack.i.h.bf16 %v2453_v32  ;;  %v2454_v36 = vunpack.i.l.bf16 %v2453_v32  ;;  %vm1434_vm9 = vweird.f32 %v1407_v29  ;;  %v2338_v28 = vld [vmem:[%s3299_s10 + $0x58] sm:$0xff] }
 0xabc   : > { %v1428_v39 = vmul.f32 %v3038_v53, %v1427_v34  ;;  %v1441_v52 = vor.u32 1.1754944e-38, %v1440_v48  ;;  %vm1439_vm11 = vcmp.eq.f32.partialorder %v1438_v50, 8.507059e+37 }
 0xabd   : > { %1521 = vmatpush.msrb.mxu0 %v2455_v35  ;;  %1573 = vmatpush.msrb.mxu2 %v2454_v36  ;;  %v1475_v40 = vpop.permute.xlu0 %1474  ;;  %v2474_v35 = vld [vmem:[%s3367_s6 + $0x1] ss:$0 sm:$0xff] }
 0xabe   : > { %1495 = vmatpush.msra.mxu3 %v1475_v40  ;;  %2320 = vmatmul.msk.f32.vlgmr.msrb.gmra.mxu2 %vm722_vm1, %v1473_v38  ;;  %v2475_v38 = vld [vmem:[%s3368_s7 + $0x1] ss:$0 sm:$0xff] }
 0xabf   : > { %2317 = vmatmul.msk.f32.vlgmr.msra.gmra.mxu3 %vm722_vm1, %v1428_v39  ;;  %1686 = vmatpush.msra.mxu0 %v2332_v17  ;;  %v1801_v17 = vld [vmem:[%s3305_s16] sm:$0xff] }
 0xac0   : > { %v2519_v42 = vpop.eup %2518  ;;  %1618 = vmatpush.msrb.mxu3 %v2324_v59  ;;  %v1770_v59 = vld [vmem:[%s3303_s14 + $0x18] sm:$0xff] }
 0xac1   : > { %v1430_v43 = vmul.f32 %v2519_v42, %v1407_v29  ;;  %v1527_v44 = vpop.permute.xlu2 %1526  ;;  %vm1435_vm6 = vweird.f32 %v2519_v42  ;;  %1790 = vmatpush.msra.mxu2 %v1770_v59 }
 0xac2   : > { %1547 = vmatpush.msrb.mxu1 %v1527_v44  ;;  %vm1436_vm10 = vmor %vm1434_vm9, %vm1435_vm6  ;;  %1619 = vmatpush.msrb.mxu3 %v2323_v60  ;;  %v2476_v44 = vld [vmem:[%s3298_s9 + $0x1] ss:$0 sm:$0xff]  ;;  %v1769_v60 = vld [vmem:[%s3303_s14 + $0x10] sm:$0xff] }
 0xac3   : > { %v1431_v47 = vsub.f32 1.0, %v1430_v43  ;;  %2319 = vmatmul.msk.f32.vlgmr.msrb.gmra.mxu1 %vm722_vm1, %v1458_v45  ;;  %v2335_v43 = vld [vmem:[%s3299_s10 + $0x40] sm:$0xff]  ;;  %1791 = vmatpush.msra.mxu2 %v1769_v60 }
 0xac4   : > { %1720 = vmatpush.msra.mxu1 %v2342_v20 }
 0xac5   : > { %v1432_v49 = vmul.f32 %v2519_v42, %v1431_v47 }
 0xac6   : > { %1721 = vmatpush.msra.mxu1 %v2341_v21 }
 0xac7   : > { %v1433_v51 = vadd.f32 %v2519_v42, %v1432_v49  ;;  %v2477_v49 = vld [vmem:[%s3300_s11 + $0x1] ss:$0 sm:$0xff] }
 0xac8   : > { %1722 = vmatpush.msra.mxu1 %v2340_v23  ;;  %v1863_v23 = vld [vmem:[%s3307_s18 + $0x10] sm:$0xff] }
 0xac9   : > { %v1437_v53 = vsel %vm1436_vm10, %v2519_v42, %v1433_v51  ;;  %v2336_v42 = vld [vmem:[%s3299_s10 + $0x48] sm:$0xff] }
 0xaca   : > { %v1442_v54 = vsel %vm1439_vm11, %v1441_v52, %v1437_v53  ;;  %1723 = vmatpush.msra.mxu1 %v2339_v26  ;;  %v1862_v26 = vld [vmem:[%s3307_s18 + $0x8] sm:$0xff] }
 0xacb   : > { %v1443_v55 = vmul.f32 %v3042_v58, %v1442_v54  ;;  %v2322_v58 = vld [vmem:[%s3364_s30 + $0x28] sm:$0xff] }
 0xacc   : > { %1620 = vmatpush.msrb.mxu3 %v2322_v58  ;;  %1724 = vmatpush.msra.mxu1 %v2338_v28  ;;  %v1768_v58 = vld [vmem:[%s3303_s14 + $0x8] sm:$0xff] }
 0xacd   : > { %2318 = vmatmul.msk.f32.vlgmr.msrb.gmra.mxu0 %vm722_vm1, %v1443_v55  ;;  %1792 = vmatpush.msra.mxu2 %v1768_v58 }
 0xace   : > { %1621 = vmatpush.msrb.mxu3 %v2321_v61  ;;  %1725 = vmatpush.msra.mxu1 %v2337_v41  ;;  %v1767_v61 = vld [vmem:[%s3303_s14] sm:$0xff] }
 0xacf   : > { %1793 = vmatpush.msra.mxu2 %v1767_v61 }
 0xad0   : > { %1726 = vmatpush.msra.mxu1 %v2336_v42 }
 0xad1   : > { %1889 = vmatpush.msrb.mxu2 %v1863_v23 }
 0xad2   : > { %1727 = vmatpush.msra.mxu1 %v2335_v43  ;;  %v2609_v43 = vmov 67  }
 0xb40   : > { %v1549_v46 = vpop.f32.mrf.mxu1 }
 0xb41   : > { %1583 = vrot.lane.b32.xlu2 %v1549_v46, %s3378_s4  ;;  %v1575_v57 = vpop.f32.mrf.mxu2  ;;  %s2602_s4 = smov 111  }
 0xb42   : > { %v1497_v63 = vpop.f32.mrf.mxu3 }
 0xb4a   : > { %v1523_v56 = vpop.f32.mrf.mxu0 }
 0xb4b   : > { %1579 = vrot.lane.b32.xlu1 %v1523_v56, %s3379_s27  ;;  %s2604_s27 = smov 94  }
 0xb53   : > { %1587 = vrot.lane.b32.xlu1 %v1575_v57, %s3380_s28  ;;  %s2606_s28 = smov 9  }
 0xb9b   : > { %v1584_v1 = vpop.permute.xlu2 %1583 }
 0xbbd   : > { %v1580_v62 = vpop.permute.xlu1 %1579 }
 0xbbe   : > { %v1590_v0 = vsel %vm722_vm1, %v1497_v63, %v1580_v62 }
 0xbbf   : > { %v1591_v3 = vsel %vm1050_vm7, %v1590_v0, %v1584_v1 }
 0xbc5   : > { %v1588_v2 = vpop.permute.xlu1 %1587 }
 0xbc6   : > { %v1592_v5 = vsel %vm1052_vm8, %v1591_v3, %v1588_v2 }
 0xbc7   : > { %2326 = vmatmul.msk.f32.vlgmr.msrb.gmra.mxu3 %vm689_vm0, %v1592_v5 }
 0xc4a   : > { %v1623_v7 = vpop.f32.mrf.mxu3 }
 0xc4b   : > { %v1624_v8 = vadd.f32 %v2473_v6, %v1623_v7 }
 0xc4d   : > { %v1626_v9 = vadd.f32 %v1624_v8, %v2981_v13  ;;  %v2331_v13 = vld [vmem:[%s3366_s8 + $0x30] sm:$0xff]  ;;  %v2478_v8 = vld [vmem:[%s3301_s12 + $0x1] ss:$0 sm:$0xff] }
 0xc4e   : > { %1687 = vmatpush.msra.mxu0 %v2331_v13  ;;  %v2480_v13 = vld [vmem:[%s3304_s15] ss:$0 sm:$0xff] }
 0xc4f   : > { %v1631_v11 = vsel %vm689_vm0, %v1626_v9, 0.0 }
 0xc50   : > { %1632 = vadd.xlane.f32.xlu0 %v1631_v11  ;;  %1688 = vmatpush.msra.mxu0 %v2330_v18 }
 0xc52   : > { %1689 = vmatpush.msra.mxu0 %v2329_v19 }
 0xcc3   : > { %v1633_v12 = vpop.xlane.xlu0 %1632 }
 0xcc4   : > { %v1634_v14 = vmul.f32 %v1633_v12, %v2904_v10 }
 0xcc6   : > { %v1635_v4 = vsub.f32 %v1626_v9, %v1634_v14 }
 0xcc8   : > { %v1636_v15 = vmul.f32 %v1635_v4, %v1635_v4 }
 0xcca   : > { %v1637_v16 = vsel %vm689_vm0, %v1636_v15, 0.0  ;;  %v1803_v15 = vld [vmem:[%s3305_s16 + $0x10] sm:$0xff] }
 0xccb   : > { %1638 = vadd.xlane.f32.xlu2 %v1637_v16  ;;  %v1802_v16 = vld [vmem:[%s3305_s16 + $0x8] sm:$0xff] }
 0xd3e   : > { %v1639_v24 = vpop.xlane.xlu2 %1638 }
 0xd3f   : > { %v1640_v25 = vmul.f32 %v1639_v24, %v2904_v10  ;;  %v1864_v24 = vld [vmem:[%s3307_s18 + $0x18] sm:$0xff] }
 0xd41   : > { %v1641_v27 = vadd.f32 1e-05, %v1640_v25  ;;  %v1861_v25 = vld [vmem:[%s3307_s18] sm:$0xff] }
 0xd42   : > { %1890 = vmatpush.msrb.mxu2 %v1861_v25 }
 0xd43   : > { %2520 = vrsqrt.f32 %v1641_v27  ;;  %vm1648_vm12 = vweird.f32 %v1641_v27 }
 0xd49   : > { %v2521_v29 = vpop.eup %2520 }
 0xd4a   : > { %v1643_v30 = vmul.f32 %v2521_v29, %v1641_v27  ;;  %vm1649_vm8 = vweird.f32 %v2521_v29 }
 0xd4b   : > { %vm1650_vm14 = vmor %vm1648_vm12, %vm1649_vm8 }
 0xd4c   : > { %v1644_v31 = vmul.f32 %v2521_v29, %v1643_v30  ;;  %v2481_v30 = vld [vmem:[%s3306_s17] ss:$0 sm:$0xff] }
 0xd4e   : > { %v1645_v32 = vmul.f32 0.5, %v1644_v31 }
 0xd50   : > { %v1646_v33 = vsub.f32 1.5, %v1645_v32 }
 0xd52   : > { %v1647_v34 = vmul.f32 %v2521_v29, %v1646_v33  ;;  %v2599_v33 = vmov 16  }
 0xd53   : > { %2456 = vset.pattern.permute.xlu1 %v2599_v33 }
 0xd54   : > { %v1651_v36 = vsel %vm1650_vm14, %v2521_v29, %v1647_v34  ;;  %v2600_v34 = vmov 50  }
 0xd55   : > { %v1652_v37 = vmul.f32 %v1651_v36, %v1635_v4  ;;  %v1804_v4 = vld [vmem:[%s3305_s16 + $0x18] sm:$0xff]  ;;  %2458 = vset.pattern.permute.xlu0 %v2600_v34  ;;  %v1865_v36 = vld [vmem:[%s3308_s19] sm:$0x3] }
 0xd56   : > { %1826 = vmatpush.msra.mxu3 %v1804_v4 }
 0xd57   : > { %v1656_v39 = vmul.f32 %v2474_v35, %v1652_v37  ;;  %v2601_v35 = vmov 33   ;;  %v1867_v37 = vperm.slane %v1865_v36, 0 }
 0xd58   : > { %1827 = vmatpush.msra.mxu3 %v1803_v15  ;;  %2457 = vset.pattern.permute.xlu2 %v2601_v35 }
 0xd59   : > { %v1660_v40 = vadd.f32 %v2475_v38, %v1656_v39 }
 0xd5a   : > { %1828 = vmatpush.msra.mxu3 %v1802_v16 }
 0xd5b   : > { %2334 = vmatmul.msk.f32.vlgmr.msra.gmra.mxu0 %vm689_vm0, %v1660_v40 }
 0xd5c   : > { %1829 = vmatpush.msra.mxu3 %v1801_v17 }
 0xd5e   : > { %1909 = vmatpush.msrb.mxu3 %v1864_v24 }
 0xd60   : > { %1910 = vmatpush.msrb.mxu3 %v1862_v26 }
 0xdd8   : > { %v1691_v45 = vpop.f32.mrf.mxu0 }
 0xdd9   : > { %v1692_v47 = vadd.f32 %v2476_v44, %v1691_v45  ;;  %v2610_v44 = vmov 7   ;;  %v2611_v45 = vmov 84  }
 0xddb   : > { %v1694_v48 = vmax.f32 %v1692_v47, 0.0  ;;  %v2612_v47 = vmov 101  }
 0xddd   : > { %2344 = vmatmul.msk.f32.vlgmr.msra.gmra.mxu1 %vm1169_vm13, %v1694_v48  ;;  %v2613_v48 = vmov 118  }
 0xe5a   : > { %v1729_v50 = vpop.f32.mrf.mxu1 }
 0xe5b   : > { %v1730_v51 = vadd.f32 %v2477_v49, %v1729_v50 }
 0xe5d   : > { %v1732_v52 = vadd.f32 %v1730_v51, %v1660_v40  ;;  %v1868_v40 = vperm.slane %v1865_v36, 1 }
 0xe5f   : > { %v1737_v53 = vsel %vm689_vm0, %v1732_v52, 0.0 }
 0xe60   : > { %1738 = vadd.xlane.f32.xlu1 %v1737_v53 }
 0xed3   : > { %v1739_v54 = vpop.xlane.xlu1 %1738 }
 0xed4   : > { %v1740_v55 = vmul.f32 %v1739_v54, %v2904_v10 }
 0xed6   : > { %v1741_v46 = vsub.f32 %v1732_v52, %v1740_v55 }
 0xed8   : > { %v1742_v56 = vmul.f32 %v1741_v46, %v1741_v46 }
 0xeda   : > { %v1743_v57 = vsel %vm689_vm0, %v1742_v56, 0.0 }
 0xedb   : > { %1744 = vadd.xlane.f32.xlu0 %v1743_v57 }
 0xf4e   : > { %v1745_v62 = vpop.xlane.xlu0 %1744 }
 0xf4f   : > { %v1746_v63 = vmul.f32 %v1745_v62, %v2904_v10  ;;  %v2479_v10 = vld [vmem:[%s3302_s13 + $0x1] ss:$0 sm:$0xff] }
 0xf51   : > { %v1747_v0 = vadd.f32 1e-05, %v1746_v63 }
 0xf53   : > { %2522 = vrsqrt.f32 %v1747_v0  ;;  %vm1754_vm15 = vweird.f32 %v1747_v0 }
 0xf59   : > { %v2523_v1 = vpop.eup %2522 }
 0xf5a   : > { %v1749_v2 = vmul.f32 %v2523_v1, %v1747_v0  ;;  %vm1755_vm13 = vweird.f32 %v2523_v1 }
 0xf5b   : > { %vm1756_vm2 = vmor %vm1754_vm15, %vm1755_vm13 }
 0xf5c   : > { %v1750_v3 = vmul.f32 %v2523_v1, %v1749_v2 }
 0xf5e   : > { %v1751_v5 = vmul.f32 0.5, %v1750_v3 }
 0xf60   : > { %v1752_v6 = vsub.f32 1.5, %v1751_v5 }
 0xf62   : > { %v1753_v7 = vmul.f32 %v2523_v1, %v1752_v6 }
 0xf64   : > { %v1757_v9 = vsel %vm1756_vm2, %v2523_v1, %v1753_v7 }
 0xf65   : > { %v1758_v11 = vmul.f32 %v1757_v9, %v1741_v46 }
 0xf67   : > { %v1762_v12 = vmul.f32 %v2478_v8, %v1758_v11 }
 0xf69   : > { %v1766_v14 = vadd.f32 %v2479_v10, %v1762_v12 }
 0xf6b   : > { %2347 = vmatmul.msk.f32.vlgmr.msra.gmra.mxu2 %vm689_vm0, %v1766_v14 }
 0xfee   : > { %v1795_v18 = vpop.f32.mrf.mxu2 }
 0xfef   : > { %v1796_v19 = vadd.f32 %v2480_v13, %v1795_v18 }
 0xff1   : > { %vm1798_vm4 = vcmp.gt.f32.partialorder %v1796_v19, 0.0  ;;  %v1799_v20 = vmul.f32 0.1, %v1796_v19 }
 0xff3   : > { %v1800_v21 = vsel %vm1798_vm4, %v1796_v19, %v1799_v20 }
 0xff4   : > { %1920 = vrot.lane.b32.xlu0 %v1800_v21, %s3373_s23  ;;  %1871 = vrot.lane.b32.xlu1 %v1800_v21, %s2598_s29  ;;  %s2608_s23 = smov 60  }
 0xff5   : > { %1810 = vrot.lane.b32.xlu2 %v1800_v21, %s3372_s2  ;;  %2349 = vmatpush.xpose.msk.msrb.mxu0 %vm689_vm0, %v1800_v21  ;;  %s2283_s2 = sshll.u32 %s3336_s0, 3 }
 0xff6   : > { %s659_s21 = scalar_lea.vmem [#allocation2], %s2283_s2  ;;  %s3383_s2 = sld [smem:[#allocation21_spill]] }
 0xff7   : > { %s2180_s7 = sshll.u32 %s659_s21, 4  ;;  %s2181_s7 = int_to_ptr.vmem [resolvable:$true] %s2180_s7 }
 0xffc   : > { %s3384_s0 = smov %s3383_s2 }
0x104f   : > { %v1811_v27 = vpop.permute.xlu2 %1810 }
0x1050   : > { %2348 = vmatmul.msk.f32.vlgmr.msra.gmra.mxu3 %vm689_vm0, %v1811_v27 }
0x1066   : > { %v1921_v28 = vpop.permute.xlu0 %1920  ;;  %v1872_v29 = vpop.permute.xlu1 %1871 }
0x1067   : > { %2351 = vmatmul.msk.f32.vlgmr.msrb.gmra.mxu2 %vm1050_vm7, %v1872_v29  ;;  %2352 = vmatmul.msk.f32.vlgmr.msrb.gmra.mxu3 %vm1050_vm7, %v1872_v29 }
0x1068   : > { %2353 = vmatpush.xpose.msk.msra.mxu0 %vm1050_vm7, %v1921_v28  ;;  %2355 = vmatpush.xpose.msk.msrb.mxu1 %vm1050_vm7, %v1921_v28 }
0x1069   : > { %2358 = vmatpush.xpose.msk.msra.mxu2 %vm1050_vm7, %v1921_v28  ;;  %2361 = vmatpush.xpose.msk.msra.mxu3 %vm1050_vm7, %v1921_v28 }
0x106c   : > { %2367 = vmatpush.xpose.msk.msra.mxu1 %vm1050_vm7, %v1921_v28 }
0x106d   : > { %2370 = vmatpush.xpose.msk.msrb.mxu2 %vm1050_vm7, %v1921_v28  ;;  %2373 = vmatpush.xpose.msk.msrb.mxu3 %vm1050_vm7, %v1921_v28 }
0x10d3   : > { %v1831_v31 = vpop.f32.mrf.mxu3 }
0x10d4   : > { %v1832_v32 = vadd.f32 %v2481_v30, %v1831_v31 }
0x10d6   : > { %2350 = vmatmul.msk.f32.vlgmr.msrb.gmra.mxu0 %vm689_vm0, %v1832_v32  ;;  %vm2136_vm0 = vcmask 72704  }
0x10d7   : > { %2364 = vmatpush.xpose.msk.msrb.mxu0 %vm1050_vm7, %v1921_v28 }
0x10ea   : > { %v1892_v38 = vpop.f32.mrf.mxu2  ;;  %v1912_v41 = vpop.f32.mrf.mxu3 }
0x10eb   : > { %v1893_v39 = vadd.f32 %v1892_v38, %v1867_v37  ;;  %v1913_v42 = vadd.f32 %v1912_v41, %v1868_v40 }
0x10ed   : > { %1951 = vrot.lane.b32.xlu1 %v1893_v39, %s2602_s4  ;;  %2011 = vrot.lane.b32.xlu0 %v1893_v39, %s2603_s22  ;;  %s3381_s22 = sld [smem:[#allocation22_spill]] }
0x10ee   : > { %1981 = vrot.lane.b32.xlu2 %v1893_v39, %s2604_s27  ;;  %2354 = vmatmul.msk.f32.vlgmr.msra.gmra.mxu0 %vm1050_vm7, %v1893_v39 }
0x10f3   : > { %s3237_s27 = scalar_lea.vmem %s3381_s22, %s2380_s5  ;;  %s3385_s5 = sand.u32 1, %s2578_s25  }
0x10f4   : > { %s2163_s29 = scalar_lea.sflag [#allocation3], %s3385_s5 }
0x10f5   : > { %2101 = vrot.lane.b32.xlu1 %v1893_v39, %s2605_s20  ;;  %2134 = vrot.lane.b32.xlu0 %v1913_v42, %s2606_s28 }
0x10f6   : > { %2132 = vrot.lane.b32.xlu2 %v1893_v39, %s2606_s28  ;;  %s2377_s28 = sshll.u32 %s2745_s3, 3 }
0x10f7   : > { %s2178_s6 = scalar_lea.hbm %s3383_s2, %s2377_s28 }
0x10f8   : > { %s2182_s26 = sshll.u32 %s2178_s6, 4  ;;  %s2183_s26 = int_to_ptr.hbm [resolvable:$true] %s2182_s26 }
0x10f9   : > { %s2538_s4 = sshra.s32 %s2183_s26, 4  ;;  %s2539_s4 = int_to_ptr.hbm [resolvable:$true] %s2538_s4 }
0x10fa   : > { %s2540_s22 = scalar_lea.hbm %s2539_s4, 8  ;;  %p2545_p0 = scmp.lt.s32.totalorder %s2539_s4, %s3384_s0 }
0x10fb   : > { %p2541_p11 = scmp.ne.s32.totalorder %s2539_s4, %s2540_s22 }
0x10fd   : > { %1917 = vperm.xlu1 %2456, %v1893_v39   ;;  %2071 = vrot.lane.b32.xlu0 %v1893_v39, %s2607_s1  ;;  %p2542_p12 = pnand %p2541_p11, %p2762_p5  ;;  %s2544_s1 = scalar_lea.hbm %s3384_s0, 16 }
0x10fe   : > { %2041 = vrot.lane.b32.xlu2 %v1893_v39, %s2608_s23  ;;  %p2546_p1 = scmp.lt.s32.totalorder %s2544_s1, %s2540_s22 }
0x10ff   : > { %p2543_p13 = pneg %p2542_p12 }
0x1100   : > { %p2547_p2 = por %p2546_p1, %p2545_p0 }
0x1102   : > { %p2548_p3 = pnand %p2547_p2, %p2543_p13 }
0x1105   : > { %2459 = vset.pattern.permute.xlu1 %v2609_v43  ;;  %1978 = vperm.xlu0 %2458, %v1893_v39  }
0x1106   : > { %1948 = vperm.xlu2 %2457, %v1893_v39   ;;  %2008 = vperm.xlu1 %2459, %v1893_v39  }
0x110d   : > { %2463 = vset.pattern.permute.xlu0 %v2610_v44 }
0x110e   : > { %2460 = vset.pattern.permute.xlu2 %v2611_v45  ;;  %2461 = vset.pattern.permute.xlu1 %v2612_v47 }
0x110f   : > { %2038 = vperm.xlu2 %2460, %v1893_v39   ;;  %2129 = vperm.xlu0 %2463, %v1913_v42  }
0x1110   : > { %2068 = vperm.xlu1 %2461, %v1893_v39  }
0x1117   : > { %2462 = vset.pattern.permute.xlu2 %v2613_v48 }
0x1118   : > { %2098 = vperm.xlu2 %2462, %v1893_v39  }
0x1148   : > { %v1982_v49 = vpop.permute.xlu2 %1981 }
0x1149   : > { %2359 = vmatmul.msk.f32.vlgmr.msra.gmra.mxu2 %vm1050_vm7, %v1982_v49 }
0x1150   : > { %v2133_v50 = vpop.permute.xlu2 %2132 }
0x1153   : > { %v1856_v51 = vpop.f32.mrf.mxu0 }
0x1154   : > { %v1859_v52 = vsel %vm2837_vm3, %v1856_v51, -inf }
0x1155   : > { %1860 = vst.msk [vmem:[%s659_s21] sm:$0xff] %vm722_vm1, %v1859_v52 }
0x1158   : > { %v2042_v53 = vpop.permute.xlu2 %2041 }
0x1159   : > { %2365 = vmatmul.msk.f32.vlgmr.msrb.gmra.mxu0 %vm1050_vm7, %v2042_v53 }
0x115f   : > { %v1952_v54 = vpop.permute.xlu1 %1951  ;;  %v2012_v55 = vpop.permute.xlu0 %2011 }
0x1160   : > { %2356 = vmatmul.msk.f32.vlgmr.msrb.gmra.mxu1 %vm1050_vm7, %v1952_v54  ;;  %2362 = vmatmul.msk.f32.vlgmr.msra.gmra.mxu3 %vm1050_vm7, %v2012_v55 }
0x1167   : > { %v2102_v46 = vpop.permute.xlu1 %2101  ;;  %v2135_v56 = vpop.permute.xlu0 %2134 }
0x1168   : > { %v2137_v57 = vsel %vm2136_vm0, %v2133_v50, %v2135_v56  ;;  %2371 = vmatmul.msk.f32.vlgmr.msrb.gmra.mxu2 %vm1050_vm7, %v2102_v46 }
0x1169   : > { %2374 = vmatmul.msk.f32.vlgmr.msrb.gmra.mxu3 %vm1050_vm7, %v2137_v57 }
0x116b   : > { %v1943_v22 = vpop.f32.mrf.mxu0 }
0x116f   : > { %v1918_v59 = vpop.permute.xlu1 %1917  ;;  %v2072_v60 = vpop.permute.xlu0 %2071 }
0x1170   : > { %v1944_v58 = vadd.f32 %v1943_v22, %v1918_v59  ;;  %2368 = vmatmul.msk.f32.vlgmr.msra.gmra.mxu1 %vm1050_vm7, %v2072_v60 }
0x1172   : > { %1946 = vst.msk [vmem:[%s3237_s27] sm:$0xff] %vm722_vm1, %v1944_v58 }
0x1173   : > { %2551 = shalt.err (!%p2548_p3)
}
0x1174   : > { %2381 = dma.vmem_to_hbm [thread:$0]  (%p2762_p5), %s2181_s7, 128, %s2183_s26, %s2163_s29   ;;  %v1949_v61 = vpop.permute.xlu2 %1948 }
0x1177   : > { %v1979_v62 = vpop.permute.xlu0 %1978 }
0x1178   : > { %v2009_v7 = vpop.permute.xlu1 %2008 }
0x117c   : > { %v2039_v1 = vpop.permute.xlu2 %2038 }
0x1181   : > { %v2130_v12 = vpop.permute.xlu0 %2129 }
0x1182   : > { %v2069_v15 = vpop.permute.xlu1 %2068 }
0x1184   : > { %v2099_v11 = vpop.permute.xlu2 %2098 }
0x11cc   : > { %v2002_v63 = vpop.f32.mrf.mxu2 }
0x11cd   : > { %v2003_v0 = vadd.f32 %v2002_v63, %v1979_v62 }
0x11cf   : > { %2360 = vst.msk [vmem:[%s3237_s27 + $0x10] sm:$0xff] %vm722_vm1, %v2003_v0 }
0x11d6   : > { %v2062_v2 = vpop.f32.mrf.mxu0 }
0x11d7   : > { %v2063_v3 = vadd.f32 %v2062_v2, %v2039_v1 }
0x11d9   : > { %2366 = vst.msk [vmem:[%s3237_s27 + $0x20] sm:$0xff] %vm722_vm1, %v2063_v3 }
0x11dd   : > { %v1972_v5 = vpop.f32.mrf.mxu1 }
0x11de   : > { %v1973_v6 = vadd.f32 %v1972_v5, %v1949_v61 }
0x11e0   : > { %2357 = vst.msk [vmem:[%s3237_s27 + $0x8] sm:$0xff] %vm722_vm1, %v1973_v6 }
0x11e3   : > { %v2032_v8 = vpop.f32.mrf.mxu3 }
0x11e4   : > { %v2033_v9 = vadd.f32 %v2032_v8, %v2009_v7 }
0x11e6   : > { %2363 = vst.msk [vmem:[%s3237_s27 + $0x18] sm:$0xff] %vm722_vm1, %v2033_v9 }
0x11eb   : > { %v2122_v10 = vpop.f32.mrf.mxu2 }
0x11ec   : > { %v2123_v14 = vadd.f32 %v2122_v10, %v2099_v11  ;;  %v2157_v4 = vpop.f32.mrf.mxu3 }
0x11ed   : > { %v2158_v16 = vadd.f32 %v2157_v4, %v2130_v12  ;;  %v2092_v17 = vpop.f32.mrf.mxu1 }
0x11ee   : > { %2372 = vst.msk [vmem:[%s3237_s27 + $0x30] sm:$0xff] %vm722_vm1, %v2123_v14  ;;  %v2093_v13 = vadd.f32 %v2092_v17, %v2069_v15 }
0x11ef   : > { %2375 = vst.msk [vmem:[%s3237_s27 + $0x38] sm:$0xff] %vm722_vm1, %v2158_v16 }
0x11f0   : > { %2369 = vst.msk [vmem:[%s3237_s27 + $0x28] sm:$0xff] %vm722_vm1, %v2093_v13 }
0x11f1 PF: > { %s3386_s6 = sld [smem:[#allocation7_spill]] }
0x11f2   : > { %s3387_s7 = sld [smem:[#allocation5_spill]] }
0x11f7   : > { %p2387_p4 = scmp.ge.s32.totalorder %s3386_s6, 2 }
0x11f8   : > { %s2197_s20 = sand.u32 1, %s3387_s7  }
0x11f9   : > { %p2384_p5 = pnand %p2387_p4, %p2766_p6  ;;  %s2198_s23 = scalar_lea.sflag [#allocation3], %s2197_s20 }
0x11fb   : > { %p2385_p7 = pneg %p2384_p5 }
0x11fd   : > { %2569 = dma.done.wait (%p2385_p7), %s2198_s23, 128  }
0x11fe   : > { %2571 = vsyncadd (%p2385_p7), %s2198_s23, 4294967168  ;;  %s3389_s27 = sld [smem:[#allocation8_spill]]  ;;  %s3392_s2 = smov %s2578_s25 }
0x11ff   : > { %s3390_s26 = sld [smem:[#allocation6_spill]] }
0x1200   : > { %s3391_s5 = sld [smem:[#allocation9_spill]] }
0x1204   : > { %p32_p8 = scmp.ge.s32.totalorder %s3389_s27, 4  }
0x1205   : > { %s3393_s25 = smov %s3390_s26 }
0x1206   : > { %s3394_s26 = smov %s3391_s5  ;;  %34 = sbr.rel (!%p32_p8) target bundleno = 15 (0xf), region = 169 }
0x120b   :  { %2212 = vsyncpa [#allocation3], 1 }
0x120c   :  { %2214 = vsyncpa [#allocation3 + $0x1], 1 }

</bundles_post_ra>
